<compile_context>
chip_gen: v6e
topology: v6e:2x2x1
jax: 0.10.0
libtpu: 0.0.40
codegen_flags: <defaults>
</compile_context>

<pallas_src>
import jax
import jax.numpy as jnp
from jax import lax
from jax.experimental import pallas as pl
from jax.experimental.pallas import tpu as pltpu

# ----- config (mirrors the PyTorch `config` object; small synthetic values) --
EMBED_DIM = 8
PROFILE_DIM = 8
INPUT_DIM = EMBED_DIM + PROFILE_DIM     # `input_dim` passed to SSENet
LSTM_HIDDEN = 16                        # config.lstm_hidden_dim
LSTM_LAYERS = 2                         # config.lstm_num_layers
NUM_LABELS = 3                          # config.num_labels
VOCAB = 26                              # len(config.IUPAC_VOCAB)
# config.dropout: identity at inference.

SUBLANE = 8
LABEL_PAD = 128                         # lane-dense head output width


# --------------------------- fused Pallas kernel ------------------------------
def _build_ssenet_kernel(T, Bp, H, num_layers, part_dims):
    """Fused kernel: num_layers bidirectional LSTM layers + MLP head.

    Gate/lane layout (G = 8H = 128 lanes):
        [ i_f | i_b | f_f | f_b | g_f | g_b | o_f | o_b ]   (each block = H lanes)
    so the fused hidden/cell state is [h_f | h_b] of width 2H and the recurrent
    matmul is a single (Bp, 2H) x (2H, 128) MXU op per time step.
    """
    H2 = 2 * H          # fused (fwd|bwd) hidden width
    G = 4 * H2          # fused gate width (= 128 for H = 16)
    n_parts = len(part_dims)

    def kernel(*args):
        x_refs = args[:n_parts]
        layer_refs = [args[n_parts + 3 * l: n_parts + 3 * (l + 1)]
                      for l in range(num_layers)]
        base = n_parts + 3 * num_layers
        wl1_ref, bl1_ref, wl2_ref, bl2_ref = args[base:base + 4]
        out_ref = args[base + 4]
        gx_sc, hs_sc = args[base + 5: base + 7]

        # Static lane masks (hoisted; built once).
        lane_g = lax.broadcasted_iota(jnp.int32, (Bp, G), 1)
        fwd_mask_g = (lane_g % H2) < H                        # fwd lanes, gate width
        g_gate_mask = (lane_g >= 2 * H2) & (lane_g < 3 * H2)  # the tanh (cell-input) gate
        lane_h = lax.broadcasted_iota(jnp.int32, (Bp, H2), 1)
        fwd_mask_h = lane_h < H                               # fwd lanes, hidden width

        def swap_reverse(buf, mask):
            # Off-critical-path, vectorized pair swap: for each (t, T-1-t) pair
            # keep the forward lanes in place and time-reverse the backward
            # lanes.  (For odd T the middle block is already correct.)
            for t in range(T // 2):
                r, rr = t * Bp, (T - 1 - t) * Bp
                a = buf[r:r + Bp, :]
                b = buf[rr:rr + Bp, :]
                buf[r:r + Bp, :] = jnp.where(mask, a, b)
                buf[rr:rr + Bp, :] = jnp.where(mask, b, a)

        def run_layer(x_parts, dims, wih_ref, whh_ref, b_ref):
            # (1) Hoisted input projection: whole sequence, both directions,
            #     bias folded in -> everything off the serial critical path.
            acc = None
            off = 0
            for xp, k in zip(x_parts, dims):
                t = jnp.dot(xp, wih_ref[off:off + k, :],
                            preferred_element_type=jnp.float32)
                acc = t if acc is None else acc + t
                off += k
            gx_sc[...] = acc + b_ref[...]

            # (2) Pre-swizzle gx: after this, row block s holds
            #     [fwd gates @ time s | bwd gates @ time T-1-s].
            swap_reverse(gx_sc, fwd_mask_g)

            # (3) Serial recurrence, fully unrolled (T small & static).
            #     h/c live in vregs; W_hh read from VMEM once per layer.
            whh = whh_ref[...]
            h = jnp.zeros((Bp, H2), jnp.float32)
            c = jnp.zeros((Bp, H2), jnp.float32)
            for s in range(T):
                r = s * Bp
                gates = gx_sc[r:r + Bp, :] + jnp.dot(
                    h, whh, preferred_element_type=jnp.float32)
                # Two full-128-lane EUP pushes + one static-mask select
                # (instead of four quarter-vreg activations).
                sig = jax.nn.sigmoid(gates)
                tnh = jnp.tanh(gates)
                act = jnp.where(g_gate_mask, tnh, sig)
                i = act[:, 0:H2]
                f = act[:, H2:2 * H2]
                g = act[:, 2 * H2:3 * H2]
                o = act[:, 3 * H2:4 * H2]
                c = f * c + i * g
                h = o * jnp.tanh(c)
                hs_sc[r:r + Bp, :] = h        # fused [h_f(s) | h_b(T-1-s)]

            # (4) Fix the time ordering of the backward half (off critical path).
            swap_reverse(hs_sc, fwd_mask_h)

        # ---- bidirectional LSTM stack (activations stay in VMEM scratch) ----
        x_parts = [ref[...] for ref in x_refs]
        dims = list(part_dims)
        for l in range(num_layers):
            wih_ref, whh_ref, b_ref = layer_refs[l]
            run_layer(x_parts, dims, wih_ref, whh_ref, b_ref)
            # layer output is fully consumed by the next projection, so the
            # single hs_sc / gx_sc buffers are safely reused across layers.
            x_parts = [hs_sc[...]]
            dims = [H2]
            # inter-layer LSTM dropout: identity at inference

        # ---- head: relu -> hidden2label1 -> relu -> (dropout=id) -> hidden2label2
        hcat = jnp.maximum(x_parts[0], 0.0)
        h1 = jnp.dot(hcat, wl1_ref[...],
                     preferred_element_type=jnp.float32) + bl1_ref[...]
        h1 = jnp.maximum(h1, 0.0)
        out_ref[...] = (jnp.dot(h1, wl2_ref[...],
                                preferred_element_type=jnp.float32)
                        + bl2_ref[...])

    return kernel


# --------------------------- weight packing (host-side, done ONCE) ------------
def _interleave_gate_cols(wf, wb, H):
    """(rows, 4H) x2 -> (rows, 8H) laid out [i_f i_b f_f f_b g_f g_b o_f o_b]."""
    r = wf.shape[0]
    return jnp.stack([wf.reshape(r, 4, H), wb.reshape(r, 4, H)],
                     axis=2).reshape(r, 8 * H)


def _pack_bilstm_layer(fwd, bwd, H):
    w_ih_f, w_hh_f, b_f = fwd
    w_ih_b, w_hh_b, b_b = bwd
    w_ih = _interleave_gate_cols(w_ih_f, w_ih_b, H)                 # (Din, 8H)
    zeros = jnp.zeros_like(w_hh_f)
    # block recurrent matrix: rows 0..H-1 drive the fwd gate lanes, rows H..2H-1
    # drive the bwd gate lanes (cross terms are zero).
    w_hh = jnp.concatenate([_interleave_gate_cols(w_hh_f, zeros, H),
                            _interleave_gate_cols(zeros, w_hh_b, H)],
                           axis=0)                                  # (2H, 8H)
    b = _interleave_gate_cols(b_f, b_b, H)                          # (1, 8H)
    return w_ih, w_hh, b


def pack_params(params):
    """Hoisted out of the forward: packed weights are prepared once."""
    H = LSTM_HIDDEN
    lstm_flat = []
    for layer in params["lstm"]:
        lstm_flat.extend(_pack_bilstm_layer(layer["fwd"], layer["bwd"], H))
    w2p = jnp.zeros((H, LABEL_PAD), jnp.float32).at[:, :NUM_LABELS].set(params["w2"])
    b2p = jnp.zeros((1, LABEL_PAD), jnp.float32).at[:, :NUM_LABELS].set(params["b2"])
    return dict(embed=params["embed"], lstm_flat=tuple(lstm_flat),
                w1=params["w1"], b1=params["b1"], w2p=w2p, b2p=b2p)


# --------------------------- parameters --------------------------------------
def _init(key, shape, scale=0.1):
    return scale * jax.random.normal(key, shape, dtype=jnp.float32)


def init_params(key):
    keys = iter(jax.random.split(key, 64))
    embed = _init(next(keys), (VOCAB, EMBED_DIM))
    # nn.Embedding(padding_idx=-1) -> row V-1 is zero
    embed = embed.at[VOCAB - 1].set(0.0)

    lstm = []
    din = INPUT_DIM
    for _ in range(LSTM_LAYERS):
        layer = {}
        for direction in ("fwd", "bwd"):
            w_ih = _init(next(keys), (din, 4 * LSTM_HIDDEN))
            w_hh = _init(next(keys), (LSTM_HIDDEN, 4 * LSTM_HIDDEN))
            b = _init(next(keys), (1, 4 * LSTM_HIDDEN))   # b_ih + b_hh combined
            layer[direction] = (w_ih, w_hh, b)
        lstm.append(layer)
        din = 2 * LSTM_HIDDEN

    w1 = _init(next(keys), (2 * LSTM_HIDDEN, LSTM_HIDDEN))
    b1 = _init(next(keys), (1, LSTM_HIDDEN))
    w2 = _init(next(keys), (LSTM_HIDDEN, NUM_LABELS))
    b2 = _init(next(keys), (1, NUM_LABELS))
    return dict(embed=embed, lstm=lstm, w1=w1, b1=b1, w2=w2, b2=b2)


# --------------------------- forward pass -------------------------------------
@jax.jit
def ssenet_forward(packed, sequence, profile):
    H = LSTM_HIDDEN
    H2, G = 2 * H, 8 * H
    B, T = sequence.shape

    # embedding lookup (plain-JAX glue); profile and embedding are passed to
    # the kernel as two separate inputs -> no HBM concat copy.
    emb = packed["embed"][sequence]                       # (B, T, E)

    Bp = ((B + SUBLANE - 1) // SUBLANE) * SUBLANE
    TB = T * Bp

    def to_2d(a):   # pad batch to sublane multiple, time-major, flatten to 2D
        a = jnp.pad(a, ((0, Bp - B), (0, 0), (0, 0)))
        return jnp.transpose(a, (1, 0, 2)).reshape(TB, a.shape[-1])

    emb2d = to_2d(emb)
    prof2d = to_2d(profile.astype(jnp.float32))
    part_dims = (EMBED_DIM, PROFILE_DIM)

    # advisory cost estimate
    flops = 2 * TB * (EMBED_DIM + PROFILE_DIM) * G          # layer-0 projection
    flops += 2 * TB * H2 * G                                # layer-1 projection
    flops += LSTM_LAYERS * T * 2 * Bp * H2 * G              # recurrent matmuls
    flops += 2 * TB * H2 * H + 2 * TB * H * LABEL_PAD       # head matmuls
    transcendentals = LSTM_LAYERS * T * (2 * Bp * G + Bp * H2)
    bytes_accessed = 4 * (TB * (EMBED_DIM + PROFILE_DIM)
                          + sum(int(w.size) for w in packed["lstm_flat"])
                          + int(packed["w1"].size) + int(packed["b1"].size)
                          + int(packed["w2p"].size) + int(packed["b2p"].size)
                          + TB * LABEL_PAD)

    # shared scratch (reused by both layers): ~40 KB total
    scratch = [pltpu.VMEM((TB, G), jnp.float32),    # precomputed/swizzled input gates
               pltpu.VMEM((TB, H2), jnp.float32)]   # fused layer-output stream

    kernel = _build_ssenet_kernel(T, Bp, H, LSTM_LAYERS, part_dims)
    out = pl.pallas_call(
        kernel,
        out_shape=jax.ShapeDtypeStruct((TB, LABEL_PAD), jnp.float32),
        scratch_shapes=scratch,
        cost_estimate=pl.CostEstimate(flops=flops,
                                      transcendentals=transcendentals,
                                      bytes_accessed=bytes_accessed),
    )(emb2d, prof2d, *packed["lstm_flat"],
      packed["w1"], packed["b1"], packed["w2p"], packed["b2p"])

    out = out.reshape(T, Bp, LABEL_PAD)
    return jnp.transpose(out, (1, 0, 2))[:B, :, :NUM_LABELS]   # (B, T, labels)


# --------------------------- pure-JAX reference -------------------------------
def _lstm_layer_ref(x, w_ih, w_hh, b):
    H = w_hh.shape[0]
    B = x.shape[1]

    def step(carry, x_t):
        h, c = carry
        gates = x_t @ w_ih + h @ w_hh + b
        i = jax.nn.sigmoid(gates[:, 0:H])
        f = jax.nn.sigmoid(gates[:, H:2 * H])
        g = jnp.tanh(gates[:, 2 * H:3 * H])
        o = jax.nn.sigmoid(gates[:, 3 * H:4 * H])
        c = f * c + i * g
        h = o * jnp.tanh(c)
        return (h, c), h

    init = (jnp.zeros((B, H), jnp.float32), jnp.zeros((B, H), jnp.float32))
    _, ys = lax.scan(step, init, x)
    return ys


def ssenet_reference(params, sequence, profile):
    emb = params["embed"][sequence]
    x = jnp.concatenate([emb, profile], axis=-1)
    x = jnp.transpose(x, (1, 0, 2))
    for layer in params["lstm"]:
        fwd = _lstm_layer_ref(x, *layer["fwd"])
        bwd = _lstm_layer_ref(x[::-1], *layer["bwd"])[::-1]
        x = jnp.concatenate([fwd, bwd], axis=-1)
    h = jnp.transpose(x, (1, 0, 2))
    h = jnp.maximum(h, 0.0) @ params["w1"] + params["b1"]
    h = jnp.maximum(h, 0.0)
    return h @ params["w2"] + params["b2"]


# --------------------------- main ---------------------------------------------
if __name__ == "__main__":
    key = jax.random.PRNGKey(0)
    k_seq, k_prof, k_par = jax.random.split(key, 3)

    B, T = 2, 8
    sequence = jax.random.randint(k_seq, (B, T), 0, VOCAB - 1, dtype=jnp.int32)
    profile = jax.random.normal(k_prof, (B, T, PROFILE_DIM), dtype=jnp.float32)
    params = init_params(k_par)
    packed = pack_params(params)          # one-time packing, off the hot path

    out = ssenet_forward(packed, sequence, profile)
    out = jax.block_until_ready(out)

    ref = ssenet_reference(params, sequence, profile)
    assert out.shape == (B, T, NUM_LABELS), out.shape
    assert jnp.allclose(out, ref, atol=1e-4, rtol=1e-4), \
        float(jnp.max(jnp.abs(out - ref)))

    print("KERNEL_OK")
</pallas_src>

<mosaic_0001>
module attributes {stable_mosaic.version = 11 : i64} {
  func.func @kernel(%arg0: memref<64x8xf32, #tpu.memory_space<vmem>>, %arg1: memref<64x8xf32, #tpu.memory_space<vmem>>, %arg2: memref<16x128xf32, #tpu.memory_space<vmem>>, %arg3: memref<32x128xf32, #tpu.memory_space<vmem>>, %arg4: memref<1x128xf32, #tpu.memory_space<vmem>>, %arg5: memref<32x128xf32, #tpu.memory_space<vmem>>, %arg6: memref<32x128xf32, #tpu.memory_space<vmem>>, %arg7: memref<1x128xf32, #tpu.memory_space<vmem>>, %arg8: memref<32x16xf32, #tpu.memory_space<vmem>>, %arg9: memref<1x16xf32, #tpu.memory_space<vmem>>, %arg10: memref<16x128xf32, #tpu.memory_space<vmem>>, %arg11: memref<1x128xf32, #tpu.memory_space<vmem>>, %arg12: memref<64x128xf32, #tpu.memory_space<vmem>>, %arg13: memref<64x128xf32, #tpu.memory_space<vmem>>, %arg14: memref<64x32xf32, #tpu.memory_space<vmem>>) attributes {dimension_semantics = [], scalar_prefetch = 0 : i64, scratch_operands = 2 : i64, tpu.core_type = #tpu.core_type<tc>} {
    %0 = tpu.iota {dimensions = array<i32: 1>} : vector<8x128xi32>
    %c32_i32 = arith.constant 32 : i32
    %c0_i32 = arith.constant 0 : i32
    %1 = arith.cmpi eq, %c32_i32, %c0_i32 : i32
    %c1_i32 = arith.constant 1 : i32
    %2 = arith.select %1, %c1_i32, %c32_i32 : i32
    %3 = vector.broadcast %2 : i32 to vector<8x128xi32>
    %4 = arith.remsi %0, %3 : vector<8x128xi32>
    %c0_i32_0 = arith.constant 0 : i32
    %5 = vector.broadcast %c0_i32_0 : i32 to vector<8x128xi32>
    %6 = arith.cmpi ne, %4, %5 : vector<8x128xi32>
    %c0_i32_1 = arith.constant 0 : i32
    %7 = vector.broadcast %c0_i32_1 : i32 to vector<8x128xi32>
    %8 = arith.cmpi slt, %4, %7 : vector<8x128xi32>
    %c0_i32_2 = arith.constant 0 : i32
    %9 = arith.cmpi slt, %2, %c0_i32_2 : i32
    %10 = vector.broadcast %9 : i1 to vector<8x128xi1>
    %11 = vector.broadcast %10 : vector<8x128xi1> to vector<8x128xi1>
    %12 = arith.xori %8, %11 : vector<8x128xi1>
    %13 = arith.andi %12, %6 : vector<8x128xi1>
    %14 = vector.broadcast %2 : i32 to vector<8x128xi32>
    %15 = arith.addi %4, %14 : vector<8x128xi32>
    %16 = arith.select %13, %15, %4 : vector<8x128xi1>, vector<8x128xi32>
    %c16_i32 = arith.constant 16 : i32
    %17 = vector.broadcast %c16_i32 : i32 to vector<8x128xi32>
    %18 = arith.cmpi slt, %16, %17 : vector<8x128xi32>
    %c64_i32 = arith.constant 64 : i32
    %19 = vector.broadcast %c64_i32 : i32 to vector<8x128xi32>
    %20 = arith.cmpi sge, %0, %19 : vector<8x128xi32>
    %c96_i32 = arith.constant 96 : i32
    %21 = vector.broadcast %c96_i32 : i32 to vector<8x128xi32>
    %22 = arith.cmpi slt, %0, %21 : vector<8x128xi32>
    %23 = arith.andi %20, %22 : vector<8x128xi1>
    %24 = tpu.iota {dimensions = array<i32: 1>} : vector<8x32xi32>
    %c16_i32_3 = arith.constant 16 : i32
    %25 = vector.broadcast %c16_i32_3 : i32 to vector<8x32xi32>
    %26 = arith.cmpi slt, %24, %25 : vector<8x32xi32>
    %c0 = arith.constant 0 : index
    %c0_4 = arith.constant 0 : index
    %27 = vector.load %arg0[%c0, %c0_4] : memref<64x8xf32, #tpu.memory_space<vmem>>, vector<64x8xf32>
    %c0_5 = arith.constant 0 : index
    %c0_6 = arith.constant 0 : index
    %28 = vector.load %arg1[%c0_5, %c0_6] : memref<64x8xf32, #tpu.memory_space<vmem>>, vector<64x8xf32>
    %c0_7 = arith.constant 0 : index
    %c0_8 = arith.constant 0 : index
    %29 = vector.load %arg2[%c0_7, %c0_8] : memref<16x128xf32, #tpu.memory_space<vmem>>, vector<8x128xf32>
    %cst = arith.constant dense<0.000000e+00> : vector<64x128xf32>
    %30 = tpu.matmul %27, %29, %cst {dimension_numbers = #tpu.dot_dimension_numbers<[1], [0], [0], [1], [0, 0, 1, 1], [], []>} : vector<64x8xf32>, vector<8x128xf32>, vector<64x128xf32> -> vector<64x128xf32>
    %c8 = arith.constant 8 : index
    %c0_9 = arith.constant 0 : index
    %31 = vector.load %arg2[%c8, %c0_9] : memref<16x128xf32, #tpu.memory_space<vmem>>, vector<8x128xf32>
    %cst_10 = arith.constant dense<0.000000e+00> : vector<64x128xf32>
    %32 = tpu.matmul %28, %31, %cst_10 {dimension_numbers = #tpu.dot_dimension_numbers<[1], [0], [0], [1], [0, 0, 1, 1], [], []>} : vector<64x8xf32>, vector<8x128xf32>, vector<64x128xf32> -> vector<64x128xf32>
    %33 = arith.addf %30, %32 : vector<64x128xf32>
    %c0_11 = arith.constant 0 : index
    %c0_12 = arith.constant 0 : index
    %34 = vector.load %arg4[%c0_11, %c0_12] : memref<1x128xf32, #tpu.memory_space<vmem>>, vector<1x128xf32>
    %35 = vector.broadcast %34 : vector<1x128xf32> to vector<64x128xf32>
    %36 = arith.addf %33, %35 : vector<64x128xf32>
    %c0_13 = arith.constant 0 : index
    %c0_14 = arith.constant 0 : index
    %37 = vector.load %arg13[%c0_13, %c0_14] : memref<64x128xf32, #tpu.memory_space<vmem>>, vector<64x128xf32>
    tpu.vector_store %arg13[%c0_13, %c0_14], %36 {strides = array<i32>} : memref<64x128xf32, #tpu.memory_space<vmem>>, vector<64x128xf32>,
    %c0_15 = arith.constant 0 : index
    %c0_16 = arith.constant 0 : index
    %38 = vector.load %arg13[%c0_15, %c0_16] : memref<64x128xf32, #tpu.memory_space<vmem>>, vector<8x128xf32>
    %c56 = arith.constant 56 : index
    %c0_17 = arith.constant 0 : index
    %39 = vector.load %arg13[%c56, %c0_17] : memref<64x128xf32, #tpu.memory_space<vmem>>, vector<8x128xf32>
    %40 = arith.select %18, %38, %39 : vector<8x128xi1>, vector<8x128xf32>
    %c0_18 = arith.constant 0 : index
    %c0_19 = arith.constant 0 : index
    %41 = vector.load %arg13[%c0_18, %c0_19] : memref<64x128xf32, #tpu.memory_space<vmem>>, vector<8x128xf32>
    tpu.vector_store %arg13[%c0_18, %c0_19], %40 {strides = array<i32>} : memref<64x128xf32, #tpu.memory_space<vmem>>, vector<8x128xf32>,
    %42 = arith.select %18, %39, %38 : vector<8x128xi1>, vector<8x128xf32>
    %c56_20 = arith.constant 56 : index
    %c0_21 = arith.constant 0 : index
    %43 = vector.load %arg13[%c56_20, %c0_21] : memref<64x128xf32, #tpu.memory_space<vmem>>, vector<8x128xf32>
    tpu.vector_store %arg13[%c56_20, %c0_21], %42 {strides = array<i32>} : memref<64x128xf32, #tpu.memory_space<vmem>>, vector<8x128xf32>,
    %c8_22 = arith.constant 8 : index
    %c0_23 = arith.constant 0 : index
    %44 = vector.load %arg13[%c8_22, %c0_23] : memref<64x128xf32, #tpu.memory_space<vmem>>, vector<8x128xf32>
    %c48 = arith.constant 48 : index
    %c0_24 = arith.constant 0 : index
    %45 = vector.load %arg13[%c48, %c0_24] : memref<64x128xf32, #tpu.memory_space<vmem>>, vector<8x128xf32>
    %46 = arith.select %18, %44, %45 : vector<8x128xi1>, vector<8x128xf32>
    %c8_25 = arith.constant 8 : index
    %c0_26 = arith.constant 0 : index
    %47 = vector.load %arg13[%c8_25, %c0_26] : memref<64x128xf32, #tpu.memory_space<vmem>>, vector<8x128xf32>
    tpu.vector_store %arg13[%c8_25, %c0_26], %46 {strides = array<i32>} : memref<64x128xf32, #tpu.memory_space<vmem>>, vector<8x128xf32>,
    %48 = arith.select %18, %45, %44 : vector<8x128xi1>, vector<8x128xf32>
    %c48_27 = arith.constant 48 : index
    %c0_28 = arith.constant 0 : index
    %49 = vector.load %arg13[%c48_27, %c0_28] : memref<64x128xf32, #tpu.memory_space<vmem>>, vector<8x128xf32>
    tpu.vector_store %arg13[%c48_27, %c0_28], %48 {strides = array<i32>} : memref<64x128xf32, #tpu.memory_space<vmem>>, vector<8x128xf32>,
    %c16 = arith.constant 16 : index
    %c0_29 = arith.constant 0 : index
    %50 = vector.load %arg13[%c16, %c0_29] : memref<64x128xf32, #tpu.memory_space<vmem>>, vector<8x128xf32>
    %c40 = arith.constant 40 : index
    %c0_30 = arith.constant 0 : index
    %51 = vector.load %arg13[%c40, %c0_30] : memref<64x128xf32, #tpu.memory_space<vmem>>, vector<8x128xf32>
    %52 = arith.select %18, %50, %51 : vector<8x128xi1>, vector<8x128xf32>
    %c16_31 = arith.constant 16 : index
    %c0_32 = arith.constant 0 : index
    %53 = vector.load %arg13[%c16_31, %c0_32] : memref<64x128xf32, #tpu.memory_space<vmem>>, vector<8x128xf32>
    tpu.vector_store %arg13[%c16_31, %c0_32], %52 {strides = array<i32>} : memref<64x128xf32, #tpu.memory_space<vmem>>, vector<8x128xf32>,
    %54 = arith.select %18, %51, %50 : vector<8x128xi1>, vector<8x128xf32>
    %c40_33 = arith.constant 40 : index
    %c0_34 = arith.constant 0 : index
    %55 = vector.load %arg13[%c40_33, %c0_34] : memref<64x128xf32, #tpu.memory_space<vmem>>, vector<8x128xf32>
    tpu.vector_store %arg13[%c40_33, %c0_34], %54 {strides = array<i32>} : memref<64x128xf32, #tpu.memory_space<vmem>>, vector<8x128xf32>,
    %c24 = arith.constant 24 : index
    %c0_35 = arith.constant 0 : index
    %56 = vector.load %arg13[%c24, %c0_35] : memref<64x128xf32, #tpu.memory_space<vmem>>, vector<8x128xf32>
    %c32 = arith.constant 32 : index
    %c0_36 = arith.constant 0 : index
    %57 = vector.load %arg13[%c32, %c0_36] : memref<64x128xf32, #tpu.memory_space<vmem>>, vector<8x128xf32>
    %58 = arith.select %18, %56, %57 : vector<8x128xi1>, vector<8x128xf32>
    %c24_37 = arith.constant 24 : index
    %c0_38 = arith.constant 0 : index
    %59 = vector.load %arg13[%c24_37, %c0_38] : memref<64x128xf32, #tpu.memory_space<vmem>>, vector<8x128xf32>
    tpu.vector_store %arg13[%c24_37, %c0_38], %58 {strides = array<i32>} : memref<64x128xf32, #tpu.memory_space<vmem>>, vector<8x128xf32>,
    %60 = arith.select %18, %57, %56 : vector<8x128xi1>, vector<8x128xf32>
    %c32_39 = arith.constant 32 : index
    %c0_40 = arith.constant 0 : index
    %61 = vector.load %arg13[%c32_39, %c0_40] : memref<64x128xf32, #tpu.memory_space<vmem>>, vector<8x128xf32>
    tpu.vector_store %arg13[%c32_39, %c0_40], %60 {strides = array<i32>} : memref<64x128xf32, #tpu.memory_space<vmem>>, vector<8x128xf32>,
    %c0_41 = arith.constant 0 : index
    %c0_42 = arith.constant 0 : index
    %62 = vector.load %arg3[%c0_41, %c0_42] : memref<32x128xf32, #tpu.memory_space<vmem>>, vector<32x128xf32>
    %cst_43 = arith.constant 0.000000e+00 : f32
    %63 = vector.broadcast %cst_43 : f32 to vector<8x32xf32>
    %cst_44 = arith.constant 0.000000e+00 : f32
    %64 = vector.broadcast %cst_44 : f32 to vector<8x32xf32>
    %c0_45 = arith.constant 0 : index
    %c0_46 = arith.constant 0 : index
    %65 = vector.load %arg13[%c0_45, %c0_46] : memref<64x128xf32, #tpu.memory_space<vmem>>, vector<8x128xf32>
    %cst_47 = arith.constant dense<0.000000e+00> : vector<8x128xf32>
    %66 = tpu.matmul %63, %62, %cst_47 {dimension_numbers = #tpu.dot_dimension_numbers<[1], [0], [0], [1], [0, 0, 1, 1], [], []>} : vector<8x32xf32>, vector<32x128xf32>, vector<8x128xf32> -> vector<8x128xf32>
    %67 = arith.addf %65, %66 : vector<8x128xf32>
    %68 = arith.negf %67 : vector<8x128xf32>
    %69 = math.exp %68 : vector<8x128xf32>
    %cst_48 = arith.constant 1.000000e+00 : f32
    %70 = vector.broadcast %cst_48 : f32 to vector<8x128xf32>
    %71 = arith.addf %70, %69 : vector<8x128xf32>
    %72 = arith.divf %70, %71 : vector<8x128xf32>
    %73 = math.tanh %67 : vector<8x128xf32>
    %74 = arith.select %23, %73, %72 : vector<8x128xi1>, vector<8x128xf32>
    %75 = vector.extract_strided_slice %74 {offsets = [0, 0], sizes = [8, 32], strides = [1, 1]} : vector<8x128xf32> to vector<8x32xf32>
    %76 = vector.extract_strided_slice %74 {offsets = [0, 32], sizes = [8, 32], strides = [1, 1]} : vector<8x128xf32> to vector<8x32xf32>
    %77 = vector.extract_strided_slice %74 {offsets = [0, 64], sizes = [8, 32], strides = [1, 1]} : vector<8x128xf32> to vector<8x32xf32>
    %78 = vector.extract_strided_slice %74 {offsets = [0, 96], sizes = [8, 32], strides = [1, 1]} : vector<8x128xf32> to vector<8x32xf32>
    %79 = arith.mulf %76, %64 : vector<8x32xf32>
    %80 = arith.mulf %75, %77 : vector<8x32xf32>
    %81 = arith.addf %79, %80 : vector<8x32xf32>
    %82 = math.tanh %81 : vector<8x32xf32>
    %83 = arith.mulf %78, %82 : vector<8x32xf32>
    %c0_49 = arith.constant 0 : index
    %c0_50 = arith.constant 0 : index
    %84 = vector.load %arg14[%c0_49, %c0_50] : memref<64x32xf32, #tpu.memory_space<vmem>>, vector<8x32xf32>
    tpu.vector_store %arg14[%c0_49, %c0_50], %83 {strides = array<i32>} : memref<64x32xf32, #tpu.memory_space<vmem>>, vector<8x32xf32>,
    %c8_51 = arith.constant 8 : index
    %c0_52 = arith.constant 0 : index
    %85 = vector.load %arg13[%c8_51, %c0_52] : memref<64x128xf32, #tpu.memory_space<vmem>>, vector<8x128xf32>
    %cst_53 = arith.constant dense<0.000000e+00> : vector<8x128xf32>
    %86 = tpu.matmul %83, %62, %cst_53 {dimension_numbers = #tpu.dot_dimension_numbers<[1], [0], [0], [1], [0, 0, 1, 1], [], []>} : vector<8x32xf32>, vector<32x128xf32>, vector<8x128xf32> -> vector<8x128xf32>
    %87 = arith.addf %85, %86 : vector<8x128xf32>
    %88 = arith.negf %87 : vector<8x128xf32>
    %89 = math.exp %88 : vector<8x128xf32>
    %cst_54 = arith.constant 1.000000e+00 : f32
    %90 = vector.broadcast %cst_54 : f32 to vector<8x128xf32>
    %91 = arith.addf %90, %89 : vector<8x128xf32>
    %92 = arith.divf %90, %91 : vector<8x128xf32>
    %93 = math.tanh %87 : vector<8x128xf32>
    %94 = arith.select %23, %93, %92 : vector<8x128xi1>, vector<8x128xf32>
    %95 = vector.extract_strided_slice %94 {offsets = [0, 0], sizes = [8, 32], strides = [1, 1]} : vector<8x128xf32> to vector<8x32xf32>
    %96 = vector.extract_strided_slice %94 {offsets = [0, 32], sizes = [8, 32], strides = [1, 1]} : vector<8x128xf32> to vector<8x32xf32>
    %97 = vector.extract_strided_slice %94 {offsets = [0, 64], sizes = [8, 32], strides = [1, 1]} : vector<8x128xf32> to vector<8x32xf32>
    %98 = vector.extract_strided_slice %94 {offsets = [0, 96], sizes = [8, 32], strides = [1, 1]} : vector<8x128xf32> to vector<8x32xf32>
    %99 = arith.mulf %96, %81 : vector<8x32xf32>
    %100 = arith.mulf %95, %97 : vector<8x32xf32>
    %101 = arith.addf %99, %100 : vector<8x32xf32>
    %102 = math.tanh %101 : vector<8x32xf32>
    %103 = arith.mulf %98, %102 : vector<8x32xf32>
    %c8_55 = arith.constant 8 : index
    %c0_56 = arith.constant 0 : index
    %104 = vector.load %arg14[%c8_55, %c0_56] : memref<64x32xf32, #tpu.memory_space<vmem>>, vector<8x32xf32>
    tpu.vector_store %arg14[%c8_55, %c0_56], %103 {strides = array<i32>} : memref<64x32xf32, #tpu.memory_space<vmem>>, vector<8x32xf32>,
    %c16_57 = arith.constant 16 : index
    %c0_58 = arith.constant 0 : index
    %105 = vector.load %arg13[%c16_57, %c0_58] : memref<64x128xf32, #tpu.memory_space<vmem>>, vector<8x128xf32>
    %cst_59 = arith.constant dense<0.000000e+00> : vector<8x128xf32>
    %106 = tpu.matmul %103, %62, %cst_59 {dimension_numbers = #tpu.dot_dimension_numbers<[1], [0], [0], [1], [0, 0, 1, 1], [], []>} : vector<8x32xf32>, vector<32x128xf32>, vector<8x128xf32> -> vector<8x128xf32>
    %107 = arith.addf %105, %106 : vector<8x128xf32>
    %108 = arith.negf %107 : vector<8x128xf32>
    %109 = math.exp %108 : vector<8x128xf32>
    %cst_60 = arith.constant 1.000000e+00 : f32
    %110 = vector.broadcast %cst_60 : f32 to vector<8x128xf32>
    %111 = arith.addf %110, %109 : vector<8x128xf32>
    %112 = arith.divf %110, %111 : vector<8x128xf32>
    %113 = math.tanh %107 : vector<8x128xf32>
    %114 = arith.select %23, %113, %112 : vector<8x128xi1>, vector<8x128xf32>
    %115 = vector.extract_strided_slice %114 {offsets = [0, 0], sizes = [8, 32], strides = [1, 1]} : vector<8x128xf32> to vector<8x32xf32>
    %116 = vector.extract_strided_slice %114 {offsets = [0, 32], sizes = [8, 32], strides = [1, 1]} : vector<8x128xf32> to vector<8x32xf32>
    %117 = vector.extract_strided_slice %114 {offsets = [0, 64], sizes = [8, 32], strides = [1, 1]} : vector<8x128xf32> to vector<8x32xf32>
    %118 = vector.extract_strided_slice %114 {offsets = [0, 96], sizes = [8, 32], strides = [1, 1]} : vector<8x128xf32> to vector<8x32xf32>
    %119 = arith.mulf %116, %101 : vector<8x32xf32>
    %120 = arith.mulf %115, %117 : vector<8x32xf32>
    %121 = arith.addf %119, %120 : vector<8x32xf32>
    %122 = math.tanh %121 : vector<8x32xf32>
    %123 = arith.mulf %118, %122 : vector<8x32xf32>
    %c16_61 = arith.constant 16 : index
    %c0_62 = arith.constant 0 : index
    %124 = vector.load %arg14[%c16_61, %c0_62] : memref<64x32xf32, #tpu.memory_space<vmem>>, vector<8x32xf32>
    tpu.vector_store %arg14[%c16_61, %c0_62], %123 {strides = array<i32>} : memref<64x32xf32, #tpu.memory_space<vmem>>, vector<8x32xf32>,
    %c24_63 = arith.constant 24 : index
    %c0_64 = arith.constant 0 : index
    %125 = vector.load %arg13[%c24_63, %c0_64] : memref<64x128xf32, #tpu.memory_space<vmem>>, vector<8x128xf32>
    %cst_65 = arith.constant dense<0.000000e+00> : vector<8x128xf32>
    %126 = tpu.matmul %123, %62, %cst_65 {dimension_numbers = #tpu.dot_dimension_numbers<[1], [0], [0], [1], [0, 0, 1, 1], [], []>} : vector<8x32xf32>, vector<32x128xf32>, vector<8x128xf32> -> vector<8x128xf32>
    %127 = arith.addf %125, %126 : vector<8x128xf32>
    %128 = arith.negf %127 : vector<8x128xf32>
    %129 = math.exp %128 : vector<8x128xf32>
    %cst_66 = arith.constant 1.000000e+00 : f32
    %130 = vector.broadcast %cst_66 : f32 to vector<8x128xf32>
    %131 = arith.addf %130, %129 : vector<8x128xf32>
    %132 = arith.divf %130, %131 : vector<8x128xf32>
    %133 = math.tanh %127 : vector<8x128xf32>
    %134 = arith.select %23, %133, %132 : vector<8x128xi1>, vector<8x128xf32>
    %135 = vector.extract_strided_slice %134 {offsets = [0, 0], sizes = [8, 32], strides = [1, 1]} : vector<8x128xf32> to vector<8x32xf32>
    %136 = vector.extract_strided_slice %134 {offsets = [0, 32], sizes = [8, 32], strides = [1, 1]} : vector<8x128xf32> to vector<8x32xf32>
    %137 = vector.extract_strided_slice %134 {offsets = [0, 64], sizes = [8, 32], strides = [1, 1]} : vector<8x128xf32> to vector<8x32xf32>
    %138 = vector.extract_strided_slice %134 {offsets = [0, 96], sizes = [8, 32], strides = [1, 1]} : vector<8x128xf32> to vector<8x32xf32>
    %139 = arith.mulf %136, %121 : vector<8x32xf32>
    %140 = arith.mulf %135, %137 : vector<8x32xf32>
    %141 = arith.addf %139, %140 : vector<8x32xf32>
    %142 = math.tanh %141 : vector<8x32xf32>
    %143 = arith.mulf %138, %142 : vector<8x32xf32>
    %c24_67 = arith.constant 24 : index
    %c0_68 = arith.constant 0 : index
    %144 = vector.load %arg14[%c24_67, %c0_68] : memref<64x32xf32, #tpu.memory_space<vmem>>, vector<8x32xf32>
    tpu.vector_store %arg14[%c24_67, %c0_68], %143 {strides = array<i32>} : memref<64x32xf32, #tpu.memory_space<vmem>>, vector<8x32xf32>,
    %c32_69 = arith.constant 32 : index
    %c0_70 = arith.constant 0 : index
    %145 = vector.load %arg13[%c32_69, %c0_70] : memref<64x128xf32, #tpu.memory_space<vmem>>, vector<8x128xf32>
    %cst_71 = arith.constant dense<0.000000e+00> : vector<8x128xf32>
    %146 = tpu.matmul %143, %62, %cst_71 {dimension_numbers = #tpu.dot_dimension_numbers<[1], [0], [0], [1], [0, 0, 1, 1], [], []>} : vector<8x32xf32>, vector<32x128xf32>, vector<8x128xf32> -> vector<8x128xf32>
    %147 = arith.addf %145, %146 : vector<8x128xf32>
    %148 = arith.negf %147 : vector<8x128xf32>
    %149 = math.exp %148 : vector<8x128xf32>
    %cst_72 = arith.constant 1.000000e+00 : f32
    %150 = vector.broadcast %cst_72 : f32 to vector<8x128xf32>
    %151 = arith.addf %150, %149 : vector<8x128xf32>
    %152 = arith.divf %150, %151 : vector<8x128xf32>
    %153 = math.tanh %147 : vector<8x128xf32>
    %154 = arith.select %23, %153, %152 : vector<8x128xi1>, vector<8x128xf32>
    %155 = vector.extract_strided_slice %154 {offsets = [0, 0], sizes = [8, 32], strides = [1, 1]} : vector<8x128xf32> to vector<8x32xf32>
    %156 = vector.extract_strided_slice %154 {offsets = [0, 32], sizes = [8, 32], strides = [1, 1]} : vector<8x128xf32> to vector<8x32xf32>
    %157 = vector.extract_strided_slice %154 {offsets = [0, 64], sizes = [8, 32], strides = [1, 1]} : vector<8x128xf32> to vector<8x32xf32>
    %158 = vector.extract_strided_slice %154 {offsets = [0, 96], sizes = [8, 32], strides = [1, 1]} : vector<8x128xf32> to vector<8x32xf32>
    %159 = arith.mulf %156, %141 : vector<8x32xf32>
    %160 = arith.mulf %155, %157 : vector<8x32xf32>
    %161 = arith.addf %159, %160 : vector<8x32xf32>
    %162 = math.tanh %161 : vector<8x32xf32>
    %163 = arith.mulf %158, %162 : vector<8x32xf32>
    %c32_73 = arith.constant 32 : index
    %c0_74 = arith.constant 0 : index
    %164 = vector.load %arg14[%c32_73, %c0_74] : memref<64x32xf32, #tpu.memory_space<vmem>>, vector<8x32xf32>
    tpu.vector_store %arg14[%c32_73, %c0_74], %163 {strides = array<i32>} : memref<64x32xf32, #tpu.memory_space<vmem>>, vector<8x32xf32>,
    %c40_75 = arith.constant 40 : index
    %c0_76 = arith.constant 0 : index
    %165 = vector.load %arg13[%c40_75, %c0_76] : memref<64x128xf32, #tpu.memory_space<vmem>>, vector<8x128xf32>
    %cst_77 = arith.constant dense<0.000000e+00> : vector<8x128xf32>
    %166 = tpu.matmul %163, %62, %cst_77 {dimension_numbers = #tpu.dot_dimension_numbers<[1], [0], [0], [1], [0, 0, 1, 1], [], []>} : vector<8x32xf32>, vector<32x128xf32>, vector<8x128xf32> -> vector<8x128xf32>
    %167 = arith.addf %165, %166 : vector<8x128xf32>
    %168 = arith.negf %167 : vector<8x128xf32>
    %169 = math.exp %168 : vector<8x128xf32>
    %cst_78 = arith.constant 1.000000e+00 : f32
    %170 = vector.broadcast %cst_78 : f32 to vector<8x128xf32>
    %171 = arith.addf %170, %169 : vector<8x128xf32>
    %172 = arith.divf %170, %171 : vector<8x128xf32>
    %173 = math.tanh %167 : vector<8x128xf32>
    %174 = arith.select %23, %173, %172 : vector<8x128xi1>, vector<8x128xf32>
    %175 = vector.extract_strided_slice %174 {offsets = [0, 0], sizes = [8, 32], strides = [1, 1]} : vector<8x128xf32> to vector<8x32xf32>
    %176 = vector.extract_strided_slice %174 {offsets = [0, 32], sizes = [8, 32], strides = [1, 1]} : vector<8x128xf32> to vector<8x32xf32>
    %177 = vector.extract_strided_slice %174 {offsets = [0, 64], sizes = [8, 32], strides = [1, 1]} : vector<8x128xf32> to vector<8x32xf32>
    %178 = vector.extract_strided_slice %174 {offsets = [0, 96], sizes = [8, 32], strides = [1, 1]} : vector<8x128xf32> to vector<8x32xf32>
    %179 = arith.mulf %176, %161 : vector<8x32xf32>
    %180 = arith.mulf %175, %177 : vector<8x32xf32>
    %181 = arith.addf %179, %180 : vector<8x32xf32>
    %182 = math.tanh %181 : vector<8x32xf32>
    %183 = arith.mulf %178, %182 : vector<8x32xf32>
    %c40_79 = arith.constant 40 : index
    %c0_80 = arith.constant 0 : index
    %184 = vector.load %arg14[%c40_79, %c0_80] : memref<64x32xf32, #tpu.memory_space<vmem>>, vector<8x32xf32>
    tpu.vector_store %arg14[%c40_79, %c0_80], %183 {strides = array<i32>} : memref<64x32xf32, #tpu.memory_space<vmem>>, vector<8x32xf32>,
    %c48_81 = arith.constant 48 : index
    %c0_82 = arith.constant 0 : index
    %185 = vector.load %arg13[%c48_81, %c0_82] : memref<64x128xf32, #tpu.memory_space<vmem>>, vector<8x128xf32>
    %cst_83 = arith.constant dense<0.000000e+00> : vector<8x128xf32>
    %186 = tpu.matmul %183, %62, %cst_83 {dimension_numbers = #tpu.dot_dimension_numbers<[1], [0], [0], [1], [0, 0, 1, 1], [], []>} : vector<8x32xf32>, vector<32x128xf32>, vector<8x128xf32> -> vector<8x128xf32>
    %187 = arith.addf %185, %186 : vector<8x128xf32>
    %188 = arith.negf %187 : vector<8x128xf32>
    %189 = math.exp %188 : vector<8x128xf32>
    %cst_84 = arith.constant 1.000000e+00 : f32
    %190 = vector.broadcast %cst_84 : f32 to vector<8x128xf32>
    %191 = arith.addf %190, %189 : vector<8x128xf32>
    %192 = arith.divf %190, %191 : vector<8x128xf32>
    %193 = math.tanh %187 : vector<8x128xf32>
    %194 = arith.select %23, %193, %192 : vector<8x128xi1>, vector<8x128xf32>
    %195 = vector.extract_strided_slice %194 {offsets = [0, 0], sizes = [8, 32], strides = [1, 1]} : vector<8x128xf32> to vector<8x32xf32>
    %196 = vector.extract_strided_slice %194 {offsets = [0, 32], sizes = [8, 32], strides = [1, 1]} : vector<8x128xf32> to vector<8x32xf32>
    %197 = vector.extract_strided_slice %194 {offsets = [0, 64], sizes = [8, 32], strides = [1, 1]} : vector<8x128xf32> to vector<8x32xf32>
    %198 = vector.extract_strided_slice %194 {offsets = [0, 96], sizes = [8, 32], strides = [1, 1]} : vector<8x128xf32> to vector<8x32xf32>
    %199 = arith.mulf %196, %181 : vector<8x32xf32>
    %200 = arith.mulf %195, %197 : vector<8x32xf32>
    %201 = arith.addf %199, %200 : vector<8x32xf32>
    %202 = math.tanh %201 : vector<8x32xf32>
    %203 = arith.mulf %198, %202 : vector<8x32xf32>
    %c48_85 = arith.constant 48 : index
    %c0_86 = arith.constant 0 : index
    %204 = vector.load %arg14[%c48_85, %c0_86] : memref<64x32xf32, #tpu.memory_space<vmem>>, vector<8x32xf32>
    tpu.vector_store %arg14[%c48_85, %c0_86], %203 {strides = array<i32>} : memref<64x32xf32, #tpu.memory_space<vmem>>, vector<8x32xf32>,
    %c56_87 = arith.constant 56 : index
    %c0_88 = arith.constant 0 : index
    %205 = vector.load %arg13[%c56_87, %c0_88] : memref<64x128xf32, #tpu.memory_space<vmem>>, vector<8x128xf32>
    %cst_89 = arith.constant dense<0.000000e+00> : vector<8x128xf32>
    %206 = tpu.matmul %203, %62, %cst_89 {dimension_numbers = #tpu.dot_dimension_numbers<[1], [0], [0], [1], [0, 0, 1, 1], [], []>} : vector<8x32xf32>, vector<32x128xf32>, vector<8x128xf32> -> vector<8x128xf32>
    %207 = arith.addf %205, %206 : vector<8x128xf32>
    %208 = arith.negf %207 : vector<8x128xf32>
    %209 = math.exp %208 : vector<8x128xf32>
    %cst_90 = arith.constant 1.000000e+00 : f32
    %210 = vector.broadcast %cst_90 : f32 to vector<8x128xf32>
    %211 = arith.addf %210, %209 : vector<8x128xf32>
    %212 = arith.divf %210, %211 : vector<8x128xf32>
    %213 = math.tanh %207 : vector<8x128xf32>
    %214 = arith.select %23, %213, %212 : vector<8x128xi1>, vector<8x128xf32>
    %215 = vector.extract_strided_slice %214 {offsets = [0, 0], sizes = [8, 32], strides = [1, 1]} : vector<8x128xf32> to vector<8x32xf32>
    %216 = vector.extract_strided_slice %214 {offsets = [0, 32], sizes = [8, 32], strides = [1, 1]} : vector<8x128xf32> to vector<8x32xf32>
    %217 = vector.extract_strided_slice %214 {offsets = [0, 64], sizes = [8, 32], strides = [1, 1]} : vector<8x128xf32> to vector<8x32xf32>
    %218 = vector.extract_strided_slice %214 {offsets = [0, 96], sizes = [8, 32], strides = [1, 1]} : vector<8x128xf32> to vector<8x32xf32>
    %219 = arith.mulf %216, %201 : vector<8x32xf32>
    %220 = arith.mulf %215, %217 : vector<8x32xf32>
    %221 = arith.addf %219, %220 : vector<8x32xf32>
    %222 = math.tanh %221 : vector<8x32xf32>
    %223 = arith.mulf %218, %222 : vector<8x32xf32>
    %c56_91 = arith.constant 56 : index
    %c0_92 = arith.constant 0 : index
    %224 = vector.load %arg14[%c56_91, %c0_92] : memref<64x32xf32, #tpu.memory_space<vmem>>, vector<8x32xf32>
    tpu.vector_store %arg14[%c56_91, %c0_92], %223 {strides = array<i32>} : memref<64x32xf32, #tpu.memory_space<vmem>>, vector<8x32xf32>,
    %c0_93 = arith.constant 0 : index
    %c0_94 = arith.constant 0 : index
    %225 = vector.load %arg14[%c0_93, %c0_94] : memref<64x32xf32, #tpu.memory_space<vmem>>, vector<8x32xf32>
    %c56_95 = arith.constant 56 : index
    %c0_96 = arith.constant 0 : index
    %226 = vector.load %arg14[%c56_95, %c0_96] : memref<64x32xf32, #tpu.memory_space<vmem>>, vector<8x32xf32>
    %227 = arith.select %26, %225, %226 : vector<8x32xi1>, vector<8x32xf32>
    %c0_97 = arith.constant 0 : index
    %c0_98 = arith.constant 0 : index
    %228 = vector.load %arg14[%c0_97, %c0_98] : memref<64x32xf32, #tpu.memory_space<vmem>>, vector<8x32xf32>
    tpu.vector_store %arg14[%c0_97, %c0_98], %227 {strides = array<i32>} : memref<64x32xf32, #tpu.memory_space<vmem>>, vector<8x32xf32>,
    %229 = arith.select %26, %226, %225 : vector<8x32xi1>, vector<8x32xf32>
    %c56_99 = arith.constant 56 : index
    %c0_100 = arith.constant 0 : index
    %230 = vector.load %arg14[%c56_99, %c0_100] : memref<64x32xf32, #tpu.memory_space<vmem>>, vector<8x32xf32>
    tpu.vector_store %arg14[%c56_99, %c0_100], %229 {strides = array<i32>} : memref<64x32xf32, #tpu.memory_space<vmem>>, vector<8x32xf32>,
    %c8_101 = arith.constant 8 : index
    %c0_102 = arith.constant 0 : index
    %231 = vector.load %arg14[%c8_101, %c0_102] : memref<64x32xf32, #tpu.memory_space<vmem>>, vector<8x32xf32>
    %c48_103 = arith.constant 48 : index
    %c0_104 = arith.constant 0 : index
    %232 = vector.load %arg14[%c48_103, %c0_104] : memref<64x32xf32, #tpu.memory_space<vmem>>, vector<8x32xf32>
    %233 = arith.select %26, %231, %232 : vector<8x32xi1>, vector<8x32xf32>
    %c8_105 = arith.constant 8 : index
    %c0_106 = arith.constant 0 : index
    %234 = vector.load %arg14[%c8_105, %c0_106] : memref<64x32xf32, #tpu.memory_space<vmem>>, vector<8x32xf32>
    tpu.vector_store %arg14[%c8_105, %c0_106], %233 {strides = array<i32>} : memref<64x32xf32, #tpu.memory_space<vmem>>, vector<8x32xf32>,
    %235 = arith.select %26, %232, %231 : vector<8x32xi1>, vector<8x32xf32>
    %c48_107 = arith.constant 48 : index
    %c0_108 = arith.constant 0 : index
    %236 = vector.load %arg14[%c48_107, %c0_108] : memref<64x32xf32, #tpu.memory_space<vmem>>, vector<8x32xf32>
    tpu.vector_store %arg14[%c48_107, %c0_108], %235 {strides = array<i32>} : memref<64x32xf32, #tpu.memory_space<vmem>>, vector<8x32xf32>,
    %c16_109 = arith.constant 16 : index
    %c0_110 = arith.constant 0 : index
    %237 = vector.load %arg14[%c16_109, %c0_110] : memref<64x32xf32, #tpu.memory_space<vmem>>, vector<8x32xf32>
    %c40_111 = arith.constant 40 : index
    %c0_112 = arith.constant 0 : index
    %238 = vector.load %arg14[%c40_111, %c0_112] : memref<64x32xf32, #tpu.memory_space<vmem>>, vector<8x32xf32>
    %239 = arith.select %26, %237, %238 : vector<8x32xi1>, vector<8x32xf32>
    %c16_113 = arith.constant 16 : index
    %c0_114 = arith.constant 0 : index
    %240 = vector.load %arg14[%c16_113, %c0_114] : memref<64x32xf32, #tpu.memory_space<vmem>>, vector<8x32xf32>
    tpu.vector_store %arg14[%c16_113, %c0_114], %239 {strides = array<i32>} : memref<64x32xf32, #tpu.memory_space<vmem>>, vector<8x32xf32>,
    %241 = arith.select %26, %238, %237 : vector<8x32xi1>, vector<8x32xf32>
    %c40_115 = arith.constant 40 : index
    %c0_116 = arith.constant 0 : index
    %242 = vector.load %arg14[%c40_115, %c0_116] : memref<64x32xf32, #tpu.memory_space<vmem>>, vector<8x32xf32>
    tpu.vector_store %arg14[%c40_115, %c0_116], %241 {strides = array<i32>} : memref<64x32xf32, #tpu.memory_space<vmem>>, vector<8x32xf32>,
    %c24_117 = arith.constant 24 : index
    %c0_118 = arith.constant 0 : index
    %243 = vector.load %arg14[%c24_117, %c0_118] : memref<64x32xf32, #tpu.memory_space<vmem>>, vector<8x32xf32>
    %c32_119 = arith.constant 32 : index
    %c0_120 = arith.constant 0 : index
    %244 = vector.load %arg14[%c32_119, %c0_120] : memref<64x32xf32, #tpu.memory_space<vmem>>, vector<8x32xf32>
    %245 = arith.select %26, %243, %244 : vector<8x32xi1>, vector<8x32xf32>
    %c24_121 = arith.constant 24 : index
    %c0_122 = arith.constant 0 : index
    %246 = vector.load %arg14[%c24_121, %c0_122] : memref<64x32xf32, #tpu.memory_space<vmem>>, vector<8x32xf32>
    tpu.vector_store %arg14[%c24_121, %c0_122], %245 {strides = array<i32>} : memref<64x32xf32, #tpu.memory_space<vmem>>, vector<8x32xf32>,
    %247 = arith.select %26, %244, %243 : vector<8x32xi1>, vector<8x32xf32>
    %c32_123 = arith.constant 32 : index
    %c0_124 = arith.constant 0 : index
    %248 = vector.load %arg14[%c32_123, %c0_124] : memref<64x32xf32, #tpu.memory_space<vmem>>, vector<8x32xf32>
    tpu.vector_store %arg14[%c32_123, %c0_124], %247 {strides = array<i32>} : memref<64x32xf32, #tpu.memory_space<vmem>>, vector<8x32xf32>,
    %c0_125 = arith.constant 0 : index
    %c0_126 = arith.constant 0 : index
    %249 = vector.load %arg14[%c0_125, %c0_126] : memref<64x32xf32, #tpu.memory_space<vmem>>, vector<64x32xf32>
    %c0_127 = arith.constant 0 : index
    %c0_128 = arith.constant 0 : index
    %250 = vector.load %arg5[%c0_127, %c0_128] : memref<32x128xf32, #tpu.memory_space<vmem>>, vector<32x128xf32>
    %cst_129 = arith.constant dense<0.000000e+00> : vector<64x128xf32>
    %251 = tpu.matmul %249, %250, %cst_129 {dimension_numbers = #tpu.dot_dimension_numbers<[1], [0], [0], [1], [0, 0, 1, 1], [], []>} : vector<64x32xf32>, vector<32x128xf32>, vector<64x128xf32> -> vector<64x128xf32>
    %c0_130 = arith.constant 0 : index
    %c0_131 = arith.constant 0 : index
    %252 = vector.load %arg7[%c0_130, %c0_131] : memref<1x128xf32, #tpu.memory_space<vmem>>, vector<1x128xf32>
    %253 = vector.broadcast %252 : vector<1x128xf32> to vector<64x128xf32>
    %254 = arith.addf %251, %253 : vector<64x128xf32>
    %c0_132 = arith.constant 0 : index
    %c0_133 = arith.constant 0 : index
    %255 = vector.load %arg13[%c0_132, %c0_133] : memref<64x128xf32, #tpu.memory_space<vmem>>, vector<64x128xf32>
    tpu.vector_store %arg13[%c0_132, %c0_133], %254 {strides = array<i32>} : memref<64x128xf32, #tpu.memory_space<vmem>>, vector<64x128xf32>,
    %c0_134 = arith.constant 0 : index
    %c0_135 = arith.constant 0 : index
    %256 = vector.load %arg13[%c0_134, %c0_135] : memref<64x128xf32, #tpu.memory_space<vmem>>, vector<8x128xf32>
    %c56_136 = arith.constant 56 : index
    %c0_137 = arith.constant 0 : index
    %257 = vector.load %arg13[%c56_136, %c0_137] : memref<64x128xf32, #tpu.memory_space<vmem>>, vector<8x128xf32>
    %258 = arith.select %18, %256, %257 : vector<8x128xi1>, vector<8x128xf32>
    %c0_138 = arith.constant 0 : index
    %c0_139 = arith.constant 0 : index
    %259 = vector.load %arg13[%c0_138, %c0_139] : memref<64x128xf32, #tpu.memory_space<vmem>>, vector<8x128xf32>
    tpu.vector_store %arg13[%c0_138, %c0_139], %258 {strides = array<i32>} : memref<64x128xf32, #tpu.memory_space<vmem>>, vector<8x128xf32>,
    %260 = arith.select %18, %257, %256 : vector<8x128xi1>, vector<8x128xf32>
    %c56_140 = arith.constant 56 : index
    %c0_141 = arith.constant 0 : index
    %261 = vector.load %arg13[%c56_140, %c0_141] : memref<64x128xf32, #tpu.memory_space<vmem>>, vector<8x128xf32>
    tpu.vector_store %arg13[%c56_140, %c0_141], %260 {strides = array<i32>} : memref<64x128xf32, #tpu.memory_space<vmem>>, vector<8x128xf32>,
    %c8_142 = arith.constant 8 : index
    %c0_143 = arith.constant 0 : index
    %262 = vector.load %arg13[%c8_142, %c0_143] : memref<64x128xf32, #tpu.memory_space<vmem>>, vector<8x128xf32>
    %c48_144 = arith.constant 48 : index
    %c0_145 = arith.constant 0 : index
    %263 = vector.load %arg13[%c48_144, %c0_145] : memref<64x128xf32, #tpu.memory_space<vmem>>, vector<8x128xf32>
    %264 = arith.select %18, %262, %263 : vector<8x128xi1>, vector<8x128xf32>
    %c8_146 = arith.constant 8 : index
    %c0_147 = arith.constant 0 : index
    %265 = vector.load %arg13[%c8_146, %c0_147] : memref<64x128xf32, #tpu.memory_space<vmem>>, vector<8x128xf32>
    tpu.vector_store %arg13[%c8_146, %c0_147], %264 {strides = array<i32>} : memref<64x128xf32, #tpu.memory_space<vmem>>, vector<8x128xf32>,
    %266 = arith.select %18, %263, %262 : vector<8x128xi1>, vector<8x128xf32>
    %c48_148 = arith.constant 48 : index
    %c0_149 = arith.constant 0 : index
    %267 = vector.load %arg13[%c48_148, %c0_149] : memref<64x128xf32, #tpu.memory_space<vmem>>, vector<8x128xf32>
    tpu.vector_store %arg13[%c48_148, %c0_149], %266 {strides = array<i32>} : memref<64x128xf32, #tpu.memory_space<vmem>>, vector<8x128xf32>,
    %c16_150 = arith.constant 16 : index
    %c0_151 = arith.constant 0 : index
    %268 = vector.load %arg13[%c16_150, %c0_151] : memref<64x128xf32, #tpu.memory_space<vmem>>, vector<8x128xf32>
    %c40_152 = arith.constant 40 : index
    %c0_153 = arith.constant 0 : index
    %269 = vector.load %arg13[%c40_152, %c0_153] : memref<64x128xf32, #tpu.memory_space<vmem>>, vector<8x128xf32>
    %270 = arith.select %18, %268, %269 : vector<8x128xi1>, vector<8x128xf32>
    %c16_154 = arith.constant 16 : index
    %c0_155 = arith.constant 0 : index
    %271 = vector.load %arg13[%c16_154, %c0_155] : memref<64x128xf32, #tpu.memory_space<vmem>>, vector<8x128xf32>
    tpu.vector_store %arg13[%c16_154, %c0_155], %270 {strides = array<i32>} : memref<64x128xf32, #tpu.memory_space<vmem>>, vector<8x128xf32>,
    %272 = arith.select %18, %269, %268 : vector<8x128xi1>, vector<8x128xf32>
    %c40_156 = arith.constant 40 : index
    %c0_157 = arith.constant 0 : index
    %273 = vector.load %arg13[%c40_156, %c0_157] : memref<64x128xf32, #tpu.memory_space<vmem>>, vector<8x128xf32>
    tpu.vector_store %arg13[%c40_156, %c0_157], %272 {strides = array<i32>} : memref<64x128xf32, #tpu.memory_space<vmem>>, vector<8x128xf32>,
    %c24_158 = arith.constant 24 : index
    %c0_159 = arith.constant 0 : index
    %274 = vector.load %arg13[%c24_158, %c0_159] : memref<64x128xf32, #tpu.memory_space<vmem>>, vector<8x128xf32>
    %c32_160 = arith.constant 32 : index
    %c0_161 = arith.constant 0 : index
    %275 = vector.load %arg13[%c32_160, %c0_161] : memref<64x128xf32, #tpu.memory_space<vmem>>, vector<8x128xf32>
    %276 = arith.select %18, %274, %275 : vector<8x128xi1>, vector<8x128xf32>
    %c24_162 = arith.constant 24 : index
    %c0_163 = arith.constant 0 : index
    %277 = vector.load %arg13[%c24_162, %c0_163] : memref<64x128xf32, #tpu.memory_space<vmem>>, vector<8x128xf32>
    tpu.vector_store %arg13[%c24_162, %c0_163], %276 {strides = array<i32>} : memref<64x128xf32, #tpu.memory_space<vmem>>, vector<8x128xf32>,
    %278 = arith.select %18, %275, %274 : vector<8x128xi1>, vector<8x128xf32>
    %c32_164 = arith.constant 32 : index
    %c0_165 = arith.constant 0 : index
    %279 = vector.load %arg13[%c32_164, %c0_165] : memref<64x128xf32, #tpu.memory_space<vmem>>, vector<8x128xf32>
    tpu.vector_store %arg13[%c32_164, %c0_165], %278 {strides = array<i32>} : memref<64x128xf32, #tpu.memory_space<vmem>>, vector<8x128xf32>,
    %c0_166 = arith.constant 0 : index
    %c0_167 = arith.constant 0 : index
    %280 = vector.load %arg6[%c0_166, %c0_167] : memref<32x128xf32, #tpu.memory_space<vmem>>, vector<32x128xf32>
    %cst_168 = arith.constant 0.000000e+00 : f32
    %281 = vector.broadcast %cst_168 : f32 to vector<8x32xf32>
    %cst_169 = arith.constant 0.000000e+00 : f32
    %282 = vector.broadcast %cst_169 : f32 to vector<8x32xf32>
    %c0_170 = arith.constant 0 : index
    %c0_171 = arith.constant 0 : index
    %283 = vector.load %arg13[%c0_170, %c0_171] : memref<64x128xf32, #tpu.memory_space<vmem>>, vector<8x128xf32>
    %cst_172 = arith.constant dense<0.000000e+00> : vector<8x128xf32>
    %284 = tpu.matmul %281, %280, %cst_172 {dimension_numbers = #tpu.dot_dimension_numbers<[1], [0], [0], [1], [0, 0, 1, 1], [], []>} : vector<8x32xf32>, vector<32x128xf32>, vector<8x128xf32> -> vector<8x128xf32>
    %285 = arith.addf %283, %284 : vector<8x128xf32>
    %286 = arith.negf %285 : vector<8x128xf32>
    %287 = math.exp %286 : vector<8x128xf32>
    %cst_173 = arith.constant 1.000000e+00 : f32
    %288 = vector.broadcast %cst_173 : f32 to vector<8x128xf32>
    %289 = arith.addf %288, %287 : vector<8x128xf32>
    %290 = arith.divf %288, %289 : vector<8x128xf32>
    %291 = math.tanh %285 : vector<8x128xf32>
    %292 = arith.select %23, %291, %290 : vector<8x128xi1>, vector<8x128xf32>
    %293 = vector.extract_strided_slice %292 {offsets = [0, 0], sizes = [8, 32], strides = [1, 1]} : vector<8x128xf32> to vector<8x32xf32>
    %294 = vector.extract_strided_slice %292 {offsets = [0, 32], sizes = [8, 32], strides = [1, 1]} : vector<8x128xf32> to vector<8x32xf32>
    %295 = vector.extract_strided_slice %292 {offsets = [0, 64], sizes = [8, 32], strides = [1, 1]} : vector<8x128xf32> to vector<8x32xf32>
    %296 = vector.extract_strided_slice %292 {offsets = [0, 96], sizes = [8, 32], strides = [1, 1]} : vector<8x128xf32> to vector<8x32xf32>
    %297 = arith.mulf %294, %282 : vector<8x32xf32>
    %298 = arith.mulf %293, %295 : vector<8x32xf32>
    %299 = arith.addf %297, %298 : vector<8x32xf32>
    %300 = math.tanh %299 : vector<8x32xf32>
    %301 = arith.mulf %296, %300 : vector<8x32xf32>
    %c0_174 = arith.constant 0 : index
    %c0_175 = arith.constant 0 : index
    %302 = vector.load %arg14[%c0_174, %c0_175] : memref<64x32xf32, #tpu.memory_space<vmem>>, vector<8x32xf32>
    tpu.vector_store %arg14[%c0_174, %c0_175], %301 {strides = array<i32>} : memref<64x32xf32, #tpu.memory_space<vmem>>, vector<8x32xf32>,
    %c8_176 = arith.constant 8 : index
    %c0_177 = arith.constant 0 : index
    %303 = vector.load %arg13[%c8_176, %c0_177] : memref<64x128xf32, #tpu.memory_space<vmem>>, vector<8x128xf32>
    %cst_178 = arith.constant dense<0.000000e+00> : vector<8x128xf32>
    %304 = tpu.matmul %301, %280, %cst_178 {dimension_numbers = #tpu.dot_dimension_numbers<[1], [0], [0], [1], [0, 0, 1, 1], [], []>} : vector<8x32xf32>, vector<32x128xf32>, vector<8x128xf32> -> vector<8x128xf32>
    %305 = arith.addf %303, %304 : vector<8x128xf32>
    %306 = arith.negf %305 : vector<8x128xf32>
    %307 = math.exp %306 : vector<8x128xf32>
    %cst_179 = arith.constant 1.000000e+00 : f32
    %308 = vector.broadcast %cst_179 : f32 to vector<8x128xf32>
    %309 = arith.addf %308, %307 : vector<8x128xf32>
    %310 = arith.divf %308, %309 : vector<8x128xf32>
    %311 = math.tanh %305 : vector<8x128xf32>
    %312 = arith.select %23, %311, %310 : vector<8x128xi1>, vector<8x128xf32>
    %313 = vector.extract_strided_slice %312 {offsets = [0, 0], sizes = [8, 32], strides = [1, 1]} : vector<8x128xf32> to vector<8x32xf32>
    %314 = vector.extract_strided_slice %312 {offsets = [0, 32], sizes = [8, 32], strides = [1, 1]} : vector<8x128xf32> to vector<8x32xf32>
    %315 = vector.extract_strided_slice %312 {offsets = [0, 64], sizes = [8, 32], strides = [1, 1]} : vector<8x128xf32> to vector<8x32xf32>
    %316 = vector.extract_strided_slice %312 {offsets = [0, 96], sizes = [8, 32], strides = [1, 1]} : vector<8x128xf32> to vector<8x32xf32>
    %317 = arith.mulf %314, %299 : vector<8x32xf32>
    %318 = arith.mulf %313, %315 : vector<8x32xf32>
    %319 = arith.addf %317, %318 : vector<8x32xf32>
    %320 = math.tanh %319 : vector<8x32xf32>
    %321 = arith.mulf %316, %320 : vector<8x32xf32>
    %c8_180 = arith.constant 8 : index
    %c0_181 = arith.constant 0 : index
    %322 = vector.load %arg14[%c8_180, %c0_181] : memref<64x32xf32, #tpu.memory_space<vmem>>, vector<8x32xf32>
    tpu.vector_store %arg14[%c8_180, %c0_181], %321 {strides = array<i32>} : memref<64x32xf32, #tpu.memory_space<vmem>>, vector<8x32xf32>,
    %c16_182 = arith.constant 16 : index
    %c0_183 = arith.constant 0 : index
    %323 = vector.load %arg13[%c16_182, %c0_183] : memref<64x128xf32, #tpu.memory_space<vmem>>, vector<8x128xf32>
    %cst_184 = arith.constant dense<0.000000e+00> : vector<8x128xf32>
    %324 = tpu.matmul %321, %280, %cst_184 {dimension_numbers = #tpu.dot_dimension_numbers<[1], [0], [0], [1], [0, 0, 1, 1], [], []>} : vector<8x32xf32>, vector<32x128xf32>, vector<8x128xf32> -> vector<8x128xf32>
    %325 = arith.addf %323, %324 : vector<8x128xf32>
    %326 = arith.negf %325 : vector<8x128xf32>
    %327 = math.exp %326 : vector<8x128xf32>
    %cst_185 = arith.constant 1.000000e+00 : f32
    %328 = vector.broadcast %cst_185 : f32 to vector<8x128xf32>
    %329 = arith.addf %328, %327 : vector<8x128xf32>
    %330 = arith.divf %328, %329 : vector<8x128xf32>
    %331 = math.tanh %325 : vector<8x128xf32>
    %332 = arith.select %23, %331, %330 : vector<8x128xi1>, vector<8x128xf32>
    %333 = vector.extract_strided_slice %332 {offsets = [0, 0], sizes = [8, 32], strides = [1, 1]} : vector<8x128xf32> to vector<8x32xf32>
    %334 = vector.extract_strided_slice %332 {offsets = [0, 32], sizes = [8, 32], strides = [1, 1]} : vector<8x128xf32> to vector<8x32xf32>
    %335 = vector.extract_strided_slice %332 {offsets = [0, 64], sizes = [8, 32], strides = [1, 1]} : vector<8x128xf32> to vector<8x32xf32>
    %336 = vector.extract_strided_slice %332 {offsets = [0, 96], sizes = [8, 32], strides = [1, 1]} : vector<8x128xf32> to vector<8x32xf32>
    %337 = arith.mulf %334, %319 : vector<8x32xf32>
    %338 = arith.mulf %333, %335 : vector<8x32xf32>
    %339 = arith.addf %337, %338 : vector<8x32xf32>
    %340 = math.tanh %339 : vector<8x32xf32>
    %341 = arith.mulf %336, %340 : vector<8x32xf32>
    %c16_186 = arith.constant 16 : index
    %c0_187 = arith.constant 0 : index
    %342 = vector.load %arg14[%c16_186, %c0_187] : memref<64x32xf32, #tpu.memory_space<vmem>>, vector<8x32xf32>
    tpu.vector_store %arg14[%c16_186, %c0_187], %341 {strides = array<i32>} : memref<64x32xf32, #tpu.memory_space<vmem>>, vector<8x32xf32>,
    %c24_188 = arith.constant 24 : index
    %c0_189 = arith.constant 0 : index
    %343 = vector.load %arg13[%c24_188, %c0_189] : memref<64x128xf32, #tpu.memory_space<vmem>>, vector<8x128xf32>
    %cst_190 = arith.constant dense<0.000000e+00> : vector<8x128xf32>
    %344 = tpu.matmul %341, %280, %cst_190 {dimension_numbers = #tpu.dot_dimension_numbers<[1], [0], [0], [1], [0, 0, 1, 1], [], []>} : vector<8x32xf32>, vector<32x128xf32>, vector<8x128xf32> -> vector<8x128xf32>
    %345 = arith.addf %343, %344 : vector<8x128xf32>
    %346 = arith.negf %345 : vector<8x128xf32>
    %347 = math.exp %346 : vector<8x128xf32>
    %cst_191 = arith.constant 1.000000e+00 : f32
    %348 = vector.broadcast %cst_191 : f32 to vector<8x128xf32>
    %349 = arith.addf %348, %347 : vector<8x128xf32>
    %350 = arith.divf %348, %349 : vector<8x128xf32>
    %351 = math.tanh %345 : vector<8x128xf32>
    %352 = arith.select %23, %351, %350 : vector<8x128xi1>, vector<8x128xf32>
    %353 = vector.extract_strided_slice %352 {offsets = [0, 0], sizes = [8, 32], strides = [1, 1]} : vector<8x128xf32> to vector<8x32xf32>
    %354 = vector.extract_strided_slice %352 {offsets = [0, 32], sizes = [8, 32], strides = [1, 1]} : vector<8x128xf32> to vector<8x32xf32>
    %355 = vector.extract_strided_slice %352 {offsets = [0, 64], sizes = [8, 32], strides = [1, 1]} : vector<8x128xf32> to vector<8x32xf32>
    %356 = vector.extract_strided_slice %352 {offsets = [0, 96], sizes = [8, 32], strides = [1, 1]} : vector<8x128xf32> to vector<8x32xf32>
    %357 = arith.mulf %354, %339 : vector<8x32xf32>
    %358 = arith.mulf %353, %355 : vector<8x32xf32>
    %359 = arith.addf %357, %358 : vector<8x32xf32>
    %360 = math.tanh %359 : vector<8x32xf32>
    %361 = arith.mulf %356, %360 : vector<8x32xf32>
    %c24_192 = arith.constant 24 : index
    %c0_193 = arith.constant 0 : index
    %362 = vector.load %arg14[%c24_192, %c0_193] : memref<64x32xf32, #tpu.memory_space<vmem>>, vector<8x32xf32>
    tpu.vector_store %arg14[%c24_192, %c0_193], %361 {strides = array<i32>} : memref<64x32xf32, #tpu.memory_space<vmem>>, vector<8x32xf32>,
    %c32_194 = arith.constant 32 : index
    %c0_195 = arith.constant 0 : index
    %363 = vector.load %arg13[%c32_194, %c0_195] : memref<64x128xf32, #tpu.memory_space<vmem>>, vector<8x128xf32>
    %cst_196 = arith.constant dense<0.000000e+00> : vector<8x128xf32>
    %364 = tpu.matmul %361, %280, %cst_196 {dimension_numbers = #tpu.dot_dimension_numbers<[1], [0], [0], [1], [0, 0, 1, 1], [], []>} : vector<8x32xf32>, vector<32x128xf32>, vector<8x128xf32> -> vector<8x128xf32>
    %365 = arith.addf %363, %364 : vector<8x128xf32>
    %366 = arith.negf %365 : vector<8x128xf32>
    %367 = math.exp %366 : vector<8x128xf32>
    %cst_197 = arith.constant 1.000000e+00 : f32
    %368 = vector.broadcast %cst_197 : f32 to vector<8x128xf32>
    %369 = arith.addf %368, %367 : vector<8x128xf32>
    %370 = arith.divf %368, %369 : vector<8x128xf32>
    %371 = math.tanh %365 : vector<8x128xf32>
    %372 = arith.select %23, %371, %370 : vector<8x128xi1>, vector<8x128xf32>
    %373 = vector.extract_strided_slice %372 {offsets = [0, 0], sizes = [8, 32], strides = [1, 1]} : vector<8x128xf32> to vector<8x32xf32>
    %374 = vector.extract_strided_slice %372 {offsets = [0, 32], sizes = [8, 32], strides = [1, 1]} : vector<8x128xf32> to vector<8x32xf32>
    %375 = vector.extract_strided_slice %372 {offsets = [0, 64], sizes = [8, 32], strides = [1, 1]} : vector<8x128xf32> to vector<8x32xf32>
    %376 = vector.extract_strided_slice %372 {offsets = [0, 96], sizes = [8, 32], strides = [1, 1]} : vector<8x128xf32> to vector<8x32xf32>
    %377 = arith.mulf %374, %359 : vector<8x32xf32>
    %378 = arith.mulf %373, %375 : vector<8x32xf32>
    %379 = arith.addf %377, %378 : vector<8x32xf32>
    %380 = math.tanh %379 : vector<8x32xf32>
    %381 = arith.mulf %376, %380 : vector<8x32xf32>
    %c32_198 = arith.constant 32 : index
    %c0_199 = arith.constant 0 : index
    %382 = vector.load %arg14[%c32_198, %c0_199] : memref<64x32xf32, #tpu.memory_space<vmem>>, vector<8x32xf32>
    tpu.vector_store %arg14[%c32_198, %c0_199], %381 {strides = array<i32>} : memref<64x32xf32, #tpu.memory_space<vmem>>, vector<8x32xf32>,
    %c40_200 = arith.constant 40 : index
    %c0_201 = arith.constant 0 : index
    %383 = vector.load %arg13[%c40_200, %c0_201] : memref<64x128xf32, #tpu.memory_space<vmem>>, vector<8x128xf32>
    %cst_202 = arith.constant dense<0.000000e+00> : vector<8x128xf32>
    %384 = tpu.matmul %381, %280, %cst_202 {dimension_numbers = #tpu.dot_dimension_numbers<[1], [0], [0], [1], [0, 0, 1, 1], [], []>} : vector<8x32xf32>, vector<32x128xf32>, vector<8x128xf32> -> vector<8x128xf32>
    %385 = arith.addf %383, %384 : vector<8x128xf32>
    %386 = arith.negf %385 : vector<8x128xf32>
    %387 = math.exp %386 : vector<8x128xf32>
    %cst_203 = arith.constant 1.000000e+00 : f32
    %388 = vector.broadcast %cst_203 : f32 to vector<8x128xf32>
    %389 = arith.addf %388, %387 : vector<8x128xf32>
    %390 = arith.divf %388, %389 : vector<8x128xf32>
    %391 = math.tanh %385 : vector<8x128xf32>
    %392 = arith.select %23, %391, %390 : vector<8x128xi1>, vector<8x128xf32>
    %393 = vector.extract_strided_slice %392 {offsets = [0, 0], sizes = [8, 32], strides = [1, 1]} : vector<8x128xf32> to vector<8x32xf32>
    %394 = vector.extract_strided_slice %392 {offsets = [0, 32], sizes = [8, 32], strides = [1, 1]} : vector<8x128xf32> to vector<8x32xf32>
    %395 = vector.extract_strided_slice %392 {offsets = [0, 64], sizes = [8, 32], strides = [1, 1]} : vector<8x128xf32> to vector<8x32xf32>
    %396 = vector.extract_strided_slice %392 {offsets = [0, 96], sizes = [8, 32], strides = [1, 1]} : vector<8x128xf32> to vector<8x32xf32>
    %397 = arith.mulf %394, %379 : vector<8x32xf32>
    %398 = arith.mulf %393, %395 : vector<8x32xf32>
    %399 = arith.addf %397, %398 : vector<8x32xf32>
    %400 = math.tanh %399 : vector<8x32xf32>
    %401 = arith.mulf %396, %400 : vector<8x32xf32>
    %c40_204 = arith.constant 40 : index
    %c0_205 = arith.constant 0 : index
    %402 = vector.load %arg14[%c40_204, %c0_205] : memref<64x32xf32, #tpu.memory_space<vmem>>, vector<8x32xf32>
    tpu.vector_store %arg14[%c40_204, %c0_205], %401 {strides = array<i32>} : memref<64x32xf32, #tpu.memory_space<vmem>>, vector<8x32xf32>,
    %c48_206 = arith.constant 48 : index
    %c0_207 = arith.constant 0 : index
    %403 = vector.load %arg13[%c48_206, %c0_207] : memref<64x128xf32, #tpu.memory_space<vmem>>, vector<8x128xf32>
    %cst_208 = arith.constant dense<0.000000e+00> : vector<8x128xf32>
    %404 = tpu.matmul %401, %280, %cst_208 {dimension_numbers = #tpu.dot_dimension_numbers<[1], [0], [0], [1], [0, 0, 1, 1], [], []>} : vector<8x32xf32>, vector<32x128xf32>, vector<8x128xf32> -> vector<8x128xf32>
    %405 = arith.addf %403, %404 : vector<8x128xf32>
    %406 = arith.negf %405 : vector<8x128xf32>
    %407 = math.exp %406 : vector<8x128xf32>
    %cst_209 = arith.constant 1.000000e+00 : f32
    %408 = vector.broadcast %cst_209 : f32 to vector<8x128xf32>
    %409 = arith.addf %408, %407 : vector<8x128xf32>
    %410 = arith.divf %408, %409 : vector<8x128xf32>
    %411 = math.tanh %405 : vector<8x128xf32>
    %412 = arith.select %23, %411, %410 : vector<8x128xi1>, vector<8x128xf32>
    %413 = vector.extract_strided_slice %412 {offsets = [0, 0], sizes = [8, 32], strides = [1, 1]} : vector<8x128xf32> to vector<8x32xf32>
    %414 = vector.extract_strided_slice %412 {offsets = [0, 32], sizes = [8, 32], strides = [1, 1]} : vector<8x128xf32> to vector<8x32xf32>
    %415 = vector.extract_strided_slice %412 {offsets = [0, 64], sizes = [8, 32], strides = [1, 1]} : vector<8x128xf32> to vector<8x32xf32>
    %416 = vector.extract_strided_slice %412 {offsets = [0, 96], sizes = [8, 32], strides = [1, 1]} : vector<8x128xf32> to vector<8x32xf32>
    %417 = arith.mulf %414, %399 : vector<8x32xf32>
    %418 = arith.mulf %413, %415 : vector<8x32xf32>
    %419 = arith.addf %417, %418 : vector<8x32xf32>
    %420 = math.tanh %419 : vector<8x32xf32>
    %421 = arith.mulf %416, %420 : vector<8x32xf32>
    %c48_210 = arith.constant 48 : index
    %c0_211 = arith.constant 0 : index
    %422 = vector.load %arg14[%c48_210, %c0_211] : memref<64x32xf32, #tpu.memory_space<vmem>>, vector<8x32xf32>
    tpu.vector_store %arg14[%c48_210, %c0_211], %421 {strides = array<i32>} : memref<64x32xf32, #tpu.memory_space<vmem>>, vector<8x32xf32>,
    %c56_212 = arith.constant 56 : index
    %c0_213 = arith.constant 0 : index
    %423 = vector.load %arg13[%c56_212, %c0_213] : memref<64x128xf32, #tpu.memory_space<vmem>>, vector<8x128xf32>
    %cst_214 = arith.constant dense<0.000000e+00> : vector<8x128xf32>
    %424 = tpu.matmul %421, %280, %cst_214 {dimension_numbers = #tpu.dot_dimension_numbers<[1], [0], [0], [1], [0, 0, 1, 1], [], []>} : vector<8x32xf32>, vector<32x128xf32>, vector<8x128xf32> -> vector<8x128xf32>
    %425 = arith.addf %423, %424 : vector<8x128xf32>
    %426 = arith.negf %425 : vector<8x128xf32>
    %427 = math.exp %426 : vector<8x128xf32>
    %cst_215 = arith.constant 1.000000e+00 : f32
    %428 = vector.broadcast %cst_215 : f32 to vector<8x128xf32>
    %429 = arith.addf %428, %427 : vector<8x128xf32>
    %430 = arith.divf %428, %429 : vector<8x128xf32>
    %431 = math.tanh %425 : vector<8x128xf32>
    %432 = arith.select %23, %431, %430 : vector<8x128xi1>, vector<8x128xf32>
    %433 = vector.extract_strided_slice %432 {offsets = [0, 0], sizes = [8, 32], strides = [1, 1]} : vector<8x128xf32> to vector<8x32xf32>
    %434 = vector.extract_strided_slice %432 {offsets = [0, 32], sizes = [8, 32], strides = [1, 1]} : vector<8x128xf32> to vector<8x32xf32>
    %435 = vector.extract_strided_slice %432 {offsets = [0, 64], sizes = [8, 32], strides = [1, 1]} : vector<8x128xf32> to vector<8x32xf32>
    %436 = vector.extract_strided_slice %432 {offsets = [0, 96], sizes = [8, 32], strides = [1, 1]} : vector<8x128xf32> to vector<8x32xf32>
    %437 = arith.mulf %434, %419 : vector<8x32xf32>
    %438 = arith.mulf %433, %435 : vector<8x32xf32>
    %439 = arith.addf %437, %438 : vector<8x32xf32>
    %440 = math.tanh %439 : vector<8x32xf32>
    %441 = arith.mulf %436, %440 : vector<8x32xf32>
    %c56_216 = arith.constant 56 : index
    %c0_217 = arith.constant 0 : index
    %442 = vector.load %arg14[%c56_216, %c0_217] : memref<64x32xf32, #tpu.memory_space<vmem>>, vector<8x32xf32>
    tpu.vector_store %arg14[%c56_216, %c0_217], %441 {strides = array<i32>} : memref<64x32xf32, #tpu.memory_space<vmem>>, vector<8x32xf32>,
    %c0_218 = arith.constant 0 : index
    %c0_219 = arith.constant 0 : index
    %443 = vector.load %arg14[%c0_218, %c0_219] : memref<64x32xf32, #tpu.memory_space<vmem>>, vector<8x32xf32>
    %c56_220 = arith.constant 56 : index
    %c0_221 = arith.constant 0 : index
    %444 = vector.load %arg14[%c56_220, %c0_221] : memref<64x32xf32, #tpu.memory_space<vmem>>, vector<8x32xf32>
    %445 = arith.select %26, %443, %444 : vector<8x32xi1>, vector<8x32xf32>
    %c0_222 = arith.constant 0 : index
    %c0_223 = arith.constant 0 : index
    %446 = vector.load %arg14[%c0_222, %c0_223] : memref<64x32xf32, #tpu.memory_space<vmem>>, vector<8x32xf32>
    tpu.vector_store %arg14[%c0_222, %c0_223], %445 {strides = array<i32>} : memref<64x32xf32, #tpu.memory_space<vmem>>, vector<8x32xf32>,
    %447 = arith.select %26, %444, %443 : vector<8x32xi1>, vector<8x32xf32>
    %c56_224 = arith.constant 56 : index
    %c0_225 = arith.constant 0 : index
    %448 = vector.load %arg14[%c56_224, %c0_225] : memref<64x32xf32, #tpu.memory_space<vmem>>, vector<8x32xf32>
    tpu.vector_store %arg14[%c56_224, %c0_225], %447 {strides = array<i32>} : memref<64x32xf32, #tpu.memory_space<vmem>>, vector<8x32xf32>,
    %c8_226 = arith.constant 8 : index
    %c0_227 = arith.constant 0 : index
    %449 = vector.load %arg14[%c8_226, %c0_227] : memref<64x32xf32, #tpu.memory_space<vmem>>, vector<8x32xf32>
    %c48_228 = arith.constant 48 : index
    %c0_229 = arith.constant 0 : index
    %450 = vector.load %arg14[%c48_228, %c0_229] : memref<64x32xf32, #tpu.memory_space<vmem>>, vector<8x32xf32>
    %451 = arith.select %26, %449, %450 : vector<8x32xi1>, vector<8x32xf32>
    %c8_230 = arith.constant 8 : index
    %c0_231 = arith.constant 0 : index
    %452 = vector.load %arg14[%c8_230, %c0_231] : memref<64x32xf32, #tpu.memory_space<vmem>>, vector<8x32xf32>
    tpu.vector_store %arg14[%c8_230, %c0_231], %451 {strides = array<i32>} : memref<64x32xf32, #tpu.memory_space<vmem>>, vector<8x32xf32>,
    %453 = arith.select %26, %450, %449 : vector<8x32xi1>, vector<8x32xf32>
    %c48_232 = arith.constant 48 : index
    %c0_233 = arith.constant 0 : index
    %454 = vector.load %arg14[%c48_232, %c0_233] : memref<64x32xf32, #tpu.memory_space<vmem>>, vector<8x32xf32>
    tpu.vector_store %arg14[%c48_232, %c0_233], %453 {strides = array<i32>} : memref<64x32xf32, #tpu.memory_space<vmem>>, vector<8x32xf32>,
    %c16_234 = arith.constant 16 : index
    %c0_235 = arith.constant 0 : index
    %455 = vector.load %arg14[%c16_234, %c0_235] : memref<64x32xf32, #tpu.memory_space<vmem>>, vector<8x32xf32>
    %c40_236 = arith.constant 40 : index
    %c0_237 = arith.constant 0 : index
    %456 = vector.load %arg14[%c40_236, %c0_237] : memref<64x32xf32, #tpu.memory_space<vmem>>, vector<8x32xf32>
    %457 = arith.select %26, %455, %456 : vector<8x32xi1>, vector<8x32xf32>
    %c16_238 = arith.constant 16 : index
    %c0_239 = arith.constant 0 : index
    %458 = vector.load %arg14[%c16_238, %c0_239] : memref<64x32xf32, #tpu.memory_space<vmem>>, vector<8x32xf32>
    tpu.vector_store %arg14[%c16_238, %c0_239], %457 {strides = array<i32>} : memref<64x32xf32, #tpu.memory_space<vmem>>, vector<8x32xf32>,
    %459 = arith.select %26, %456, %455 : vector<8x32xi1>, vector<8x32xf32>
    %c40_240 = arith.constant 40 : index
    %c0_241 = arith.constant 0 : index
    %460 = vector.load %arg14[%c40_240, %c0_241] : memref<64x32xf32, #tpu.memory_space<vmem>>, vector<8x32xf32>
    tpu.vector_store %arg14[%c40_240, %c0_241], %459 {strides = array<i32>} : memref<64x32xf32, #tpu.memory_space<vmem>>, vector<8x32xf32>,
    %c24_242 = arith.constant 24 : index
    %c0_243 = arith.constant 0 : index
    %461 = vector.load %arg14[%c24_242, %c0_243] : memref<64x32xf32, #tpu.memory_space<vmem>>, vector<8x32xf32>
    %c32_244 = arith.constant 32 : index
    %c0_245 = arith.constant 0 : index
    %462 = vector.load %arg14[%c32_244, %c0_245] : memref<64x32xf32, #tpu.memory_space<vmem>>, vector<8x32xf32>
    %463 = arith.select %26, %461, %462 : vector<8x32xi1>, vector<8x32xf32>
    %c24_246 = arith.constant 24 : index
    %c0_247 = arith.constant 0 : index
    %464 = vector.load %arg14[%c24_246, %c0_247] : memref<64x32xf32, #tpu.memory_space<vmem>>, vector<8x32xf32>
    tpu.vector_store %arg14[%c24_246, %c0_247], %463 {strides = array<i32>} : memref<64x32xf32, #tpu.memory_space<vmem>>, vector<8x32xf32>,
    %465 = arith.select %26, %462, %461 : vector<8x32xi1>, vector<8x32xf32>
    %c32_248 = arith.constant 32 : index
    %c0_249 = arith.constant 0 : index
    %466 = vector.load %arg14[%c32_248, %c0_249] : memref<64x32xf32, #tpu.memory_space<vmem>>, vector<8x32xf32>
    tpu.vector_store %arg14[%c32_248, %c0_249], %465 {strides = array<i32>} : memref<64x32xf32, #tpu.memory_space<vmem>>, vector<8x32xf32>,
    %c0_250 = arith.constant 0 : index
    %c0_251 = arith.constant 0 : index
    %467 = vector.load %arg14[%c0_250, %c0_251] : memref<64x32xf32, #tpu.memory_space<vmem>>, vector<64x32xf32>
    %cst_252 = arith.constant 0.000000e+00 : f32
    %468 = vector.broadcast %cst_252 : f32 to vector<64x32xf32>
    %469 = arith.maximumf %467, %468 : vector<64x32xf32>
    %c0_253 = arith.constant 0 : index
    %c0_254 = arith.constant 0 : index
    %470 = vector.load %arg8[%c0_253, %c0_254] : memref<32x16xf32, #tpu.memory_space<vmem>>, vector<32x16xf32>
    %cst_255 = arith.constant dense<0.000000e+00> : vector<64x16xf32>
    %471 = tpu.matmul %469, %470, %cst_255 {dimension_numbers = #tpu.dot_dimension_numbers<[1], [0], [0], [1], [0, 0, 1, 1], [], []>} : vector<64x32xf32>, vector<32x16xf32>, vector<64x16xf32> -> vector<64x16xf32>
    %c0_256 = arith.constant 0 : index
    %c0_257 = arith.constant 0 : index
    %472 = vector.load %arg9[%c0_256, %c0_257] : memref<1x16xf32, #tpu.memory_space<vmem>>, vector<1x16xf32>
    %473 = vector.broadcast %472 : vector<1x16xf32> to vector<64x16xf32>
    %474 = arith.addf %471, %473 : vector<64x16xf32>
    %cst_258 = arith.constant 0.000000e+00 : f32
    %475 = vector.broadcast %cst_258 : f32 to vector<64x16xf32>
    %476 = arith.maximumf %474, %475 : vector<64x16xf32>
    %c0_259 = arith.constant 0 : index
    %c0_260 = arith.constant 0 : index
    %477 = vector.load %arg10[%c0_259, %c0_260] : memref<16x128xf32, #tpu.memory_space<vmem>>, vector<16x128xf32>
    %cst_261 = arith.constant dense<0.000000e+00> : vector<64x128xf32>
    %478 = tpu.matmul %476, %477, %cst_261 {dimension_numbers = #tpu.dot_dimension_numbers<[1], [0], [0], [1], [0, 0, 1, 1], [], []>} : vector<64x16xf32>, vector<16x128xf32>, vector<64x128xf32> -> vector<64x128xf32>
    %c0_262 = arith.constant 0 : index
    %c0_263 = arith.constant 0 : index
    %479 = vector.load %arg11[%c0_262, %c0_263] : memref<1x128xf32, #tpu.memory_space<vmem>>, vector<1x128xf32>
    %480 = vector.broadcast %479 : vector<1x128xf32> to vector<64x128xf32>
    %481 = arith.addf %478, %480 : vector<64x128xf32>
    %c0_264 = arith.constant 0 : index
    %c0_265 = arith.constant 0 : index
    %482 = vector.load %arg12[%c0_264, %c0_265] : memref<64x128xf32, #tpu.memory_space<vmem>>, vector<64x128xf32>
    tpu.vector_store %arg12[%c0_264, %c0_265], %481 {strides = array<i32>} : memref<64x128xf32, #tpu.memory_space<vmem>>, vector<64x128xf32>,
    return
  }
}

</mosaic_0001>

<bundles_post_ra>
// kernel: ssenet_forward.1
= control target key start
LH: loop header
LB: loop body
LE: loop exit
PB: predicated region body
PF: predicated region fallthrough
CT: control target
= control target key end

     0   :  { %vm78_vm0 = vcmask 64512   ;;  %v3197_v9 = vmov 0.0   ;;  %vm3198_vm1 = vmmov 0   ;;  %v41_v23 = vlaneseq  ;;  %s3972_s2 = inlined_call_operand.vmem [shape: f32[16,128], index: 2, kind: input, shape index: {}]   ;;  %s3973_s1 = inlined_call_operand.vmem [shape: f32[64,8], index: 1, kind: input, shape index: {}]   ;;  %s3974_s0 = inlined_call_operand.vmem [shape: f32[64,8], index: 0, kind: input, shape index: {}]   ;;  %s3975_s3 = inlined_call_operand.vmem [shape: f32[32,128], index: 3, kind: input, shape index: {}]   ;;  %s3976_s4 = inlined_call_operand.vmem [shape: f32[1,128], index: 4, kind: input, shape index: {}]   ;;  %s3977_s5 = inlined_call_operand.vmem [shape: f32[32,128], index: 5, kind: input, shape index: {}]   ;;  %s3978_s6 = inlined_call_operand.vmem [shape: f32[32,128], index: 6, kind: input, shape index: {}]   ;;  %s3979_s7 = inlined_call_operand.vmem [shape: f32[1,128], index: 7, kind: input, shape index: {}]   ;;  %s3980_s8 = inlined_call_operand.vmem [shape: f32[32,16], index: 8, kind: input, shape index: {}]   ;;  %s3981_s10 = inlined_call_operand.vmem [shape: f32[16,128], index: 10, kind: input, shape index: {}]   ;;  %s3982_s9 = inlined_call_operand.vmem [shape: f32[1,16], index: 9, kind: input, shape index: {}]   ;;  %s3983_s11 = inlined_call_operand.vmem [shape: f32[1,128], index: 11, kind: input, shape index: {}]   ;;  %s3984_s12 = inlined_call_operand.vmem [shape: f32[64,128], index: 12, kind: output, shape index: {}]  }
   0x1   :  { %v77_v0 = vld [vmem:[%s3972_s2 + $0x8] sm:$0xff]  ;;  %v76_v1 = vld [vmem:[%s3972_s2] sm:$0xff]  ;;  %v70_v6 = vld [vmem:[%s3973_s1 + $0x10] sm:$0xff]  ;;  %vm389_vm6 = vcmask 261120   ;;  %vm2457_vm8 = vcmask 130048  }
   0x2   :  { %v68_v2 = vld [vmem:[%s3973_s1] sm:$0xff]  ;;  %2805 = vmatprep.subr.mxu0 %v77_v0  ;;  %2819 = vmatprep.subr.mxu1 %v76_v1  ;;  %v69_v4 = vld [vmem:[%s3973_s1 + $0x8] sm:$0xff]  ;;  %v3292_v7 = vld [vmem:[%s3975_s3 + $0x18] sm:$0xff]  ;;  %v3392_v30 = vand.u32 127, %v41_v23 }
   0x3   :  { %v60_v3 = vld [vmem:[%s3974_s0] sm:$0xff]  ;;  %v61_v5 = vld [vmem:[%s3974_s0 + $0x8] sm:$0xff]  ;;  %2806 = vmatpush3.msra.mxu0 %v77_v0  ;;  %2807 = vmatprep.mubr.msk.f32.mxu0 %vm78_vm0, %v68_v2  ;;  %v62_v8 = vld [vmem:[%s3974_s0 + $0x10] sm:$0xff] }
   0x4   :  { %2820 = vmatpush3.msra.mxu1 %v76_v1  ;;  %2821 = vmatprep.mubr.msk.f32.mxu1 %vm78_vm0, %v60_v3  ;;  %v71_v10 = vld [vmem:[%s3973_s1 + $0x18] sm:$0xff]  ;;  %v3312_v12 = vld [vmem:[%s3975_s3 + $0x10] sm:$0xff]  ;;  %v72_v13 = vld [vmem:[%s3973_s1 + $0x20] sm:$0xff]  ;;  %v47_v37 = vand.u32 31, %v3392_v30  ;;  %vm56_vm3 = vcmp.ge.s32.totalorder %v3392_v30, 64  ;;  %vm57_vm4 = vcmp.lt.s32.totalorder %v3392_v30, 96 }
   0x5   :  { %2808 = vmatmul.mubr.msk.f32.vlgmr.msra.gmra.mxu0 %vm78_vm0, %v69_v4  ;;  %2822 = vmatmul.mubr.msk.f32.vlgmr.msra.gmra.mxu1 %vm78_vm0, %v61_v5  ;;  %v63_v11 = vld [vmem:[%s3974_s0 + $0x18] sm:$0xff]  ;;  %v64_v14 = vld [vmem:[%s3974_s0 + $0x20] sm:$0xff]  ;;  %v3327_v15 = vld [vmem:[%s3975_s3 + $0x8] sm:$0xff]  ;;  %vm59_vm7 = vcmp.lt.s32.totalorder %v3392_v30, 16 }
   0x6   :  { %2833 = vmatprep.subr.mxu0 %v3197_v9  ;;  %2810 = vmatprep.mubr.msk.f32.mxu0 %vm78_vm0, %v70_v6  ;;  %v73_v16 = vld [vmem:[%s3973_s1 + $0x28] sm:$0xff]  ;;  %v74_v18 = vld [vmem:[%s3973_s1 + $0x30] sm:$0xff]  ;;  %v3352_v20 = vld [vmem:[%s3975_s3] sm:$0xff]  ;;  %vm3401_vm2 = vcmp.lt.s32.totalorder %v47_v37, 16  ;;  %s3199_s3 = smov 64  }
   0x7   :  { %2834 = vmatpush3.msra.mxu0 %v3292_v7  ;;  %2824 = vmatprep.mubr.msk.f32.mxu1 %vm78_vm0, %v62_v8  ;;  %v65_v17 = vld [vmem:[%s3974_s0 + $0x28] sm:$0xff]  ;;  %v66_v19 = vld [vmem:[%s3974_s0 + $0x30] sm:$0xff]  ;;  %v75_v21 = vld [vmem:[%s3973_s1 + $0x38] sm:$0xff] }
   0x8   :  { %2835 = vmatprep.subr.mxu0 %v3197_v9  ;;  %2844 = vmatprep.subr.mxu1 %v3197_v9  ;;  %v67_v22 = vld [vmem:[%s3974_s0 + $0x38] sm:$0xff]  ;;  %v2615_v26 = vld [vmem:[%s3976_s4] ss:$0 sm:$0xff]  ;;  %vm3449_vm5 = vmand %vm56_vm3, %vm57_vm4  ;;  %s3200_s4 = smov 32  }
   0x9   :  { %2811 = vmatmul.mubr.msk.f32.gmra.mxu0 %vm78_vm0, %v71_v10  ;;  %2825 = vmatmul.mubr.msk.f32.gmra.mxu1 %vm78_vm0, %v63_v11 }
   0xa   :  { %2836 = vmatpush3.msra.mxu0 %v3312_v12  ;;  %2813 = vmatprep.mubr.msk.f32.mxu0 %vm78_vm0, %v72_v13  ;;  %v2302_v13 = vld [vmem:[%s3980_s8 + $0x10] sm:$0xff] }
   0xb   :  { %2827 = vmatprep.mubr.msk.f32.mxu1 %vm78_vm0, %v64_v14  ;;  %2837 = vmatprep.subr.mxu0 %v3197_v9 }
   0xc   :  { %2838 = vmatpush3.msra.mxu0 %v3327_v15  ;;  %2845 = vmatpush3.msra.mxu1 %v3292_v7 }
   0xd   :  { %2814 = vmatmul.mubr.msk.f32.gmra.mxu0 %vm78_vm0, %v73_v16  ;;  %2828 = vmatmul.mubr.msk.f32.gmra.mxu1 %vm78_vm0, %v65_v17 }
   0xe   :  { %2816 = vmatprep.mubr.msk.f32.mxu0 %vm78_vm0, %v74_v18  ;;  %2830 = vmatprep.mubr.msk.f32.mxu1 %vm78_vm0, %v66_v19 }
   0xf   :  { %2839 = vmatprep.subr.mxu0 %v3197_v9  ;;  %2846 = vmatprep.subr.mxu1 %v3197_v9 }
  0x10   :  { %2840 = vmatpush3.msra.mxu0 %v3352_v20  ;;  %2847 = vmatpush3.msra.mxu1 %v3312_v12 }
  0x11   :  { %2817 = vmatmul.mubr.msk.f32.gmra.mxu0 %vm78_vm0, %v75_v21  ;;  %2831 = vmatmul.mubr.msk.f32.gmra.mxu1 %vm78_vm0, %v67_v22 }
  0x12   :  { %2841 = vmatprep.mubr.msk.f32.mxu0 %vm3198_vm1, %v3197_v9  ;;  %2848 = vmatprep.subr.mxu1 %v3197_v9 }
  0x13   :  { %2849 = vmatpush3.msra.mxu1 %v3327_v15  ;;  %2852 = vmatprep.mubr.msk.f32.mxu1 %vm3198_vm1, %v3197_v9 }
  0x14   :  { %2850 = vmatprep.subr.mxu1 %v3197_v9  ;;  %2855 = vmatprep.subr.mxu0 %v3197_v9 }
  0x15   :  { %2842 = vmatmul.mubr.f32.vlgmr.msra.gmra.mxu0 %v3197_v9  ;;  %2851 = vmatpush3.msra.mxu1 %v3352_v20 }
  0x16   :  { %2856 = vmatpush3.msra.mxu0 %v3292_v7  ;;  %2863 = vmatprep.mubr.msk.f32.mxu0 %vm3198_vm1, %v3197_v9 }
  0x17   :  { %2857 = vmatprep.subr.mxu0 %v3197_v9  ;;  %2866 = vmatprep.subr.mxu1 %v3197_v9 }
  0x18   :  { %2858 = vmatpush3.msra.mxu0 %v3312_v12 }
  0x19   :  { %2859 = vmatprep.subr.mxu0 %v3197_v9 }
  0x1a   :  { %2860 = vmatpush3.msra.mxu0 %v3327_v15 }
  0x1b   :  { %2861 = vmatprep.subr.mxu0 %v3197_v9 }
  0x1c   :  { %2862 = vmatpush3.msra.mxu0 %v3352_v20 }
  0x1d   :  { %2877 = vmatprep.subr.mxu0 %v3197_v9 }
  0xc5   :  { %v2809_v24 = vpop.f32.mrf.mxu0  ;;  %v2823_v25 = vpop.f32.mrf.mxu1 }
  0xc6   :  { %v304_v27 = vadd.f32 %v2823_v25, %v2809_v24 }
  0xc7   :  { %v169_v28 = vpop.f32.mrf.mxu0  ;;  %v298_v29 = vpop.f32.mrf.mxu1 }
  0xc8   :  { %v3394_v31 = vadd.f32 %v2615_v26, %v304_v27  ;;  %v299_v44 = vadd.f32 %v298_v29, %v169_v28 }
  0xc9   :  { %v2812_v32 = vpop.f32.mrf.mxu0  ;;  %v2826_v33 = vpop.f32.mrf.mxu1 }
  0xca   :  { %v314_v34 = vadd.f32 %v2826_v33, %v2812_v32  ;;  %v3417_v56 = vadd.f32 %v2615_v26, %v299_v44 }
  0xcb   :  { %v179_v35 = vpop.f32.mrf.mxu0  ;;  %v308_v36 = vpop.f32.mrf.mxu1 }
  0xcc   :  { %v3397_v38 = vadd.f32 %v2615_v26, %v314_v34  ;;  %v309_v39 = vadd.f32 %v308_v36, %v179_v35 }
  0xcd   :  { %v2815_v40 = vpop.f32.mrf.mxu0  ;;  %v2829_v41 = vpop.f32.mrf.mxu1 }
  0xce   :  { %v3399_v42 = vadd.f32 %v2615_v26, %v309_v39  ;;  %v324_v43 = vadd.f32 %v2829_v41, %v2815_v40 }
  0xcf   :  { %v189_v45 = vpop.f32.mrf.mxu0  ;;  %v318_v46 = vpop.f32.mrf.mxu1 }
  0xd0   :  { %v3405_v48 = vadd.f32 %v2615_v26, %v324_v43  ;;  %v319_v49 = vadd.f32 %v318_v46, %v189_v45 }
  0xd1   :  { %v2818_v50 = vpop.f32.mrf.mxu0  ;;  %v2832_v51 = vpop.f32.mrf.mxu1 }
  0xd2   :  { %v3407_v52 = vadd.f32 %v2615_v26, %v319_v49  ;;  %v334_v53 = vadd.f32 %v2832_v51, %v2818_v50  ;;  %v374_v54 = vsel %vm3401_vm2, %v3399_v42, %v3405_v48  ;;  %v376_v55 = vsel %vm3401_vm2, %v3405_v48, %v3399_v42 }
  0xd3   :  { %v199_v57 = vpop.f32.mrf.mxu0  ;;  %v328_v58 = vpop.f32.mrf.mxu1 }
  0xd4   :  { %v3419_v59 = vadd.f32 %v2615_v26, %v334_v53  ;;  %v329_v60 = vadd.f32 %v328_v58, %v199_v57  ;;  %v380_v61 = vsel %vm3401_vm2, %v3397_v38, %v3407_v52  ;;  %v382_v62 = vsel %vm3401_vm2, %v3407_v52, %v3397_v38 }
  0xd5   :  { %v459_v63 = vpop.f32.mrf.mxu0 }
  0xd6   :  { %v3429_v0 = vadd.f32 %v2615_v26, %v329_v60  ;;  %v362_v1 = vsel %vm3401_vm2, %v3417_v56, %v3419_v59  ;;  %v364_v2 = vsel %vm3401_vm2, %v3419_v59, %v3417_v56 }
  0xd7   :  { %v463_v3 = vadd.f32 %v459_v63, %v362_v1  ;;  %v2843_v4 = vpop.f32.mrf.mxu0 }
  0xd8   :  { %v368_v5 = vsel %vm3401_vm2, %v3394_v31, %v3429_v0  ;;  %v370_v6 = vsel %vm3401_vm2, %v3429_v0, %v3394_v31 }
  0xd9   :  { %v2616_v8 = vmul.f32 -1.442695, %v463_v3 }
  0xdb   :  { %3069 = vpow2.f32 %v2616_v8 }
  0xdc   :  { %3071 = vtanh.f32 %v463_v3 }
  0xe8   :  { %v3070_v10 = vpop.eup %3069 }
  0xe9   :  { %v467_v11 = vadd.f32 1.0, %v3070_v10  ;;  %v3072_v14 = vpop.eup %3071 }
  0xeb   :  { %3073 = vrcp.f32 %v467_v11 }
  0xf8   :  { %v3074_v16 = vpop.eup %3073 }
  0xf9   :  { %v471_v17 = vsel %vm3449_vm5, %v3072_v14, %v3074_v16 }
  0xfa   :  { %474 = vrot.lane.b32.xlu0 %v471_v17, %s3199_s3  ;;  %v472_v21 = vmul.f32 0.0, %v471_v17 }
 0x16c   :  { %v475_v18 = vpop.permute.xlu0 %474 }
 0x16d   :  { %v477_v19 = vmul.f32 %v475_v18, %v471_v17 }
 0x16f   :  { %479 = vrot.lane.b32.xlu0 %v477_v19, %s3200_s4 }
 0x1e1   :  { %v480_v22 = vpop.permute.xlu0 %479 }
 0x1e2   :  { %v482_v23 = vadd.f32 %v480_v22, %v472_v21 }
 0x1e4   :  { %3075 = vtanh.f32 %v482_v23 }
 0x1f1   :  { %v3076_v24 = vpop.eup %3075 }
 0x1f2   :  { %485 = vrot.lane.b32.xlu1 %v3076_v24, %s3199_s3 }
 0x264   :  { %v486_v25 = vpop.permute.xlu1 %485 }
 0x265   :  { %v488_v26 = vmul.f32 %v486_v25, %v471_v17 }
 0x267   :  { %490 = vrot.lane.b32.xlu1 %v488_v26, %s3200_s4 }
 0x2d9   :  { %v491_v27 = vpop.permute.xlu1 %490 }
 0x2da   :  { %493 = vst.msk [vmem:[#allocation3] sm:$0xff] %vm389_vm6, %v491_v27  ;;  %2853 = vmatmul.mubr.msk.f32.vlgmr.msra.gmra.mxu1 %vm389_vm6, %v491_v27 }
 0x2db   :  { %2867 = vmatpush3.msra.mxu1 %v3292_v7  ;;  %2874 = vmatprep.mubr.msk.f32.mxu1 %vm3198_vm1, %v3197_v9 }
 0x2dc   :  { %2868 = vmatprep.subr.mxu1 %v3197_v9 }
 0x2dd   :  { %2869 = vmatpush3.msra.mxu1 %v3312_v12 }
 0x2de   :  { %2870 = vmatprep.subr.mxu1 %v3197_v9 }
 0x2df   :  { %2871 = vmatpush3.msra.mxu1 %v3327_v15 }
 0x2e0   :  { %2872 = vmatprep.subr.mxu1 %v3197_v9 }
 0x2e1   :  { %2873 = vmatpush3.msra.mxu1 %v3352_v20 }
 0x2e2   :  { %2888 = vmatprep.subr.mxu1 %v3197_v9 }
 0x39a   :  { %v563_v28 = vpop.f32.mrf.mxu1 }
 0x39b   :  { %v567_v29 = vadd.f32 %v563_v28, %v368_v5 }
 0x39c   :  { %v2854_v32 = vpop.f32.mrf.mxu1 }
 0x39d   :  { %v2618_v33 = vmul.f32 -1.442695, %v567_v29 }
 0x39f   :  { %3077 = vpow2.f32 %v2618_v33 }
 0x3a0   :  { %3079 = vtanh.f32 %v567_v29 }
 0x3ac   :  { %v3078_v34 = vpop.eup %3077 }
 0x3ad   :  { %v571_v35 = vadd.f32 1.0, %v3078_v34  ;;  %v3080_v36 = vpop.eup %3079 }
 0x3af   :  { %3081 = vrcp.f32 %v571_v35 }
 0x3bc   :  { %v3082_v37 = vpop.eup %3081 }
 0x3bd   :  { %v575_v39 = vsel %vm3449_vm5, %v3080_v36, %v3082_v37 }
 0x3be   :  { %578 = vrot.lane.b32.xlu0 %v575_v39, %s3199_s3  ;;  %v576_v43 = vmul.f32 %v575_v39, %v482_v23 }
 0x430   :  { %v579_v40 = vpop.permute.xlu0 %578 }
 0x431   :  { %v581_v41 = vmul.f32 %v579_v40, %v575_v39 }
 0x433   :  { %583 = vrot.lane.b32.xlu1 %v581_v41, %s3200_s4 }
 0x4a5   :  { %v584_v44 = vpop.permute.xlu1 %583 }
 0x4a6   :  { %v586_v45 = vadd.f32 %v584_v44, %v576_v43 }
 0x4a8   :  { %3083 = vtanh.f32 %v586_v45 }
 0x4b5   :  { %v3084_v46 = vpop.eup %3083 }
 0x4b6   :  { %589 = vrot.lane.b32.xlu0 %v3084_v46, %s3199_s3 }
 0x528   :  { %v590_v49 = vpop.permute.xlu0 %589 }
 0x529   :  { %v592_v50 = vmul.f32 %v590_v49, %v575_v39 }
 0x52b   :  { %594 = vrot.lane.b32.xlu1 %v592_v50, %s3200_s4 }
 0x59d   :  { %v595_v51 = vpop.permute.xlu1 %594 }
 0x59e   :  { %597 = vst.msk [vmem:[#allocation3 + $0x8] sm:$0xff] %vm389_vm6, %v595_v51  ;;  %2864 = vmatmul.mubr.msk.f32.vlgmr.msra.gmra.mxu0 %vm389_vm6, %v595_v51 }
 0x59f   :  { %2878 = vmatpush3.msra.mxu0 %v3292_v7  ;;  %2885 = vmatprep.mubr.msk.f32.mxu0 %vm3198_vm1, %v3197_v9 }
 0x5a0   :  { %2879 = vmatprep.subr.mxu0 %v3197_v9 }
 0x5a1   :  { %2880 = vmatpush3.msra.mxu0 %v3312_v12 }
 0x5a2   :  { %2881 = vmatprep.subr.mxu0 %v3197_v9 }
 0x5a3   :  { %2882 = vmatpush3.msra.mxu0 %v3327_v15 }
 0x5a4   :  { %2883 = vmatprep.subr.mxu0 %v3197_v9 }
 0x5a5   :  { %2884 = vmatpush3.msra.mxu0 %v3352_v20 }
 0x5a6   :  { %2899 = vmatprep.subr.mxu0 %v3197_v9 }
 0x65e   :  { %v667_v53 = vpop.f32.mrf.mxu0 }
 0x65f   :  { %v671_v57 = vadd.f32 %v667_v53, %v374_v54 }
 0x660   :  { %v2865_v58 = vpop.f32.mrf.mxu0 }
 0x661   :  { %v2620_v60 = vmul.f32 -1.442695, %v671_v57 }
 0x663   :  { %3085 = vpow2.f32 %v2620_v60 }
 0x664   :  { %3087 = vtanh.f32 %v671_v57 }
 0x670   :  { %v3086_v63 = vpop.eup %3085 }
 0x671   :  { %v675_v1 = vadd.f32 1.0, %v3086_v63  ;;  %v3088_v3 = vpop.eup %3087 }
 0x673   :  { %3089 = vrcp.f32 %v675_v1 }
 0x680   :  { %v3090_v4 = vpop.eup %3089 }
 0x681   :  { %v679_v5 = vsel %vm3449_vm5, %v3088_v3, %v3090_v4 }
 0x682   :  { %682 = vrot.lane.b32.xlu0 %v679_v5, %s3199_s3  ;;  %v680_v11 = vmul.f32 %v679_v5, %v586_v45 }
 0x6f4   :  { %v683_v8 = vpop.permute.xlu0 %682 }
 0x6f5   :  { %v685_v10 = vmul.f32 %v683_v8, %v679_v5 }
 0x6f7   :  { %687 = vrot.lane.b32.xlu1 %v685_v10, %s3200_s4 }
 0x769   :  { %v688_v54 = vpop.permute.xlu1 %687 }
 0x76a   :  { %v690_v14 = vadd.f32 %v688_v54, %v680_v11 }
 0x76c   :  { %3091 = vtanh.f32 %v690_v14 }
 0x779   :  { %v3092_v16 = vpop.eup %3091 }
 0x77a   :  { %693 = vrot.lane.b32.xlu0 %v3092_v16, %s3199_s3 }
 0x7ec   :  { %v694_v17 = vpop.permute.xlu0 %693 }
 0x7ed   :  { %v696_v18 = vmul.f32 %v694_v17, %v679_v5 }
 0x7ef   :  { %698 = vrot.lane.b32.xlu1 %v696_v18, %s3200_s4 }
 0x861   :  { %v699_v19 = vpop.permute.xlu1 %698 }
 0x862   :  { %701 = vst.msk [vmem:[#allocation3 + $0x10] sm:$0xff] %vm389_vm6, %v699_v19  ;;  %2875 = vmatmul.mubr.msk.f32.vlgmr.msra.gmra.mxu1 %vm389_vm6, %v699_v19 }
 0x863   :  { %2889 = vmatpush3.msra.mxu1 %v3292_v7  ;;  %2896 = vmatprep.mubr.msk.f32.mxu1 %vm3198_vm1, %v3197_v9 }
 0x864   :  { %2890 = vmatprep.subr.mxu1 %v3197_v9 }
 0x865   :  { %2891 = vmatpush3.msra.mxu1 %v3312_v12 }
 0x866   :  { %2892 = vmatprep.subr.mxu1 %v3197_v9 }
 0x867   :  { %2893 = vmatpush3.msra.mxu1 %v3327_v15 }
 0x868   :  { %2894 = vmatprep.subr.mxu1 %v3197_v9 }
 0x869   :  { %2895 = vmatpush3.msra.mxu1 %v3352_v20 }
 0x86a   :  { %2910 = vmatprep.subr.mxu1 %v3197_v9 }
 0x922   :  { %v771_v21 = vpop.f32.mrf.mxu1 }
 0x923   :  { %v775_v22 = vadd.f32 %v771_v21, %v380_v61 }
 0x924   :  { %v2876_v23 = vpop.f32.mrf.mxu1 }
 0x925   :  { %v2622_v24 = vmul.f32 -1.442695, %v775_v22 }
 0x927   :  { %3093 = vpow2.f32 %v2622_v24 }
 0x928   :  { %3095 = vtanh.f32 %v775_v22 }
 0x934   :  { %v3094_v25 = vpop.eup %3093 }
 0x935   :  { %v779_v26 = vadd.f32 1.0, %v3094_v25  ;;  %v3096_v27 = vpop.eup %3095  ;;  %v1234_v25 = vld [vmem:[#allocation3 + $0x10] sm:$0xff] }
 0x937   :  { %3097 = vrcp.f32 %v779_v26 }
 0x944   :  { %v3098_v28 = vpop.eup %3097 }
 0x945   :  { %v783_v29 = vsel %vm3449_vm5, %v3096_v27, %v3098_v28 }
 0x946   :  { %786 = vrot.lane.b32.xlu0 %v783_v29, %s3199_s3  ;;  %v784_v34 = vmul.f32 %v783_v29, %v690_v14 }
 0x9b8   :  { %v787_v32 = vpop.permute.xlu0 %786 }
 0x9b9   :  { %v789_v33 = vmul.f32 %v787_v32, %v783_v29 }
 0x9bb   :  { %791 = vrot.lane.b32.xlu1 %v789_v33, %s3200_s4 }
 0xa2d   :  { %v792_v61 = vpop.permute.xlu1 %791 }
 0xa2e   :  { %v794_v35 = vadd.f32 %v792_v61, %v784_v34 }
 0xa30   :  { %3099 = vtanh.f32 %v794_v35 }
 0xa3d   :  { %v3100_v36 = vpop.eup %3099 }
 0xa3e   :  { %797 = vrot.lane.b32.xlu0 %v3100_v36, %s3199_s3 }
 0xab0   :  { %v798_v37 = vpop.permute.xlu0 %797 }
 0xab1   :  { %v800_v39 = vmul.f32 %v798_v37, %v783_v29 }
 0xab3   :  { %802 = vrot.lane.b32.xlu1 %v800_v39, %s3200_s4 }
 0xb25   :  { %v803_v40 = vpop.permute.xlu1 %802 }
 0xb26   :  { %805 = vst.msk [vmem:[#allocation3 + $0x18] sm:$0xff] %vm389_vm6, %v803_v40  ;;  %2886 = vmatmul.mubr.msk.f32.vlgmr.msra.gmra.mxu0 %vm389_vm6, %v803_v40 }
 0xb27   :  { %2900 = vmatpush3.msra.mxu0 %v3292_v7  ;;  %2907 = vmatprep.mubr.msk.f32.mxu0 %vm3198_vm1, %v3197_v9 }
 0xb28   :  { %2901 = vmatprep.subr.mxu0 %v3197_v9 }
 0xb29   :  { %2902 = vmatpush3.msra.mxu0 %v3312_v12 }
 0xb2a   :  { %2903 = vmatprep.subr.mxu0 %v3197_v9 }
 0xb2b   :  { %2904 = vmatpush3.msra.mxu0 %v3327_v15 }
 0xb2c   :  { %2905 = vmatprep.subr.mxu0 %v3197_v9 }
 0xb2d   :  { %2906 = vmatpush3.msra.mxu0 %v3352_v20  ;;  %v1240_v4 = vld [vmem:[#allocation3 + $0x18] sm:$0xff] }
 0xbe6   :  { %v875_v41 = vpop.f32.mrf.mxu0 }
 0xbe7   :  { %v879_v43 = vadd.f32 %v875_v41, %v382_v62 }
 0xbe8   :  { %v2887_v44 = vpop.f32.mrf.mxu0 }
 0xbe9   :  { %v2624_v45 = vmul.f32 -1.442695, %v879_v43 }
 0xbeb   :  { %3101 = vpow2.f32 %v2624_v45 }
 0xbec   :  { %3103 = vtanh.f32 %v879_v43 }
 0xbf8   :  { %v3102_v46 = vpop.eup %3101 }
 0xbf9   :  { %v883_v49 = vadd.f32 1.0, %v3102_v46  ;;  %v3104_v50 = vpop.eup %3103 }
 0xbfb   :  { %3105 = vrcp.f32 %v883_v49  ;;  %v1228_v49 = vld [vmem:[#allocation3 + $0x8] sm:$0xff] }
 0xc08   :  { %v3106_v51 = vpop.eup %3105 }
 0xc09   :  { %v887_v53 = vsel %vm3449_vm5, %v3104_v50, %v3106_v51 }
 0xc0a   :  { %890 = vrot.lane.b32.xlu0 %v887_v53, %s3199_s3  ;;  %v888_v38 = vmul.f32 %v887_v53, %v794_v35 }
 0xc7c   :  { %v891_v57 = vpop.permute.xlu0 %890 }
 0xc7d   :  { %v893_v58 = vmul.f32 %v891_v57, %v887_v53 }
 0xc7f   :  { %895 = vrot.lane.b32.xlu1 %v893_v58, %s3200_s4 }
 0xcf1   :  { %v896_v52 = vpop.permute.xlu1 %895 }
 0xcf2   :  { %v898_v62 = vadd.f32 %v896_v52, %v888_v38 }
 0xcf4   :  { %3107 = vtanh.f32 %v898_v62 }
 0xd01   :  { %v3108_v60 = vpop.eup %3107 }
 0xd02   :  { %901 = vrot.lane.b32.xlu0 %v3108_v60, %s3199_s3 }
 0xd74   :  { %v902_v63 = vpop.permute.xlu0 %901 }
 0xd75   :  { %v904_v1 = vmul.f32 %v902_v63, %v887_v53 }
 0xd77   :  { %906 = vrot.lane.b32.xlu1 %v904_v1, %s3200_s4 }
 0xde9   :  { %v907_v3 = vpop.permute.xlu1 %906 }
 0xdea   :  { %909 = vst.msk [vmem:[#allocation3 + $0x20] sm:$0xff] %vm389_vm6, %v907_v3  ;;  %2897 = vmatmul.mubr.msk.f32.vlgmr.msra.gmra.mxu1 %vm389_vm6, %v907_v3 }
 0xdeb   :  { %2911 = vmatpush3.msra.mxu1 %v3292_v7  ;;  %2918 = vmatprep.mubr.msk.f32.mxu1 %vm3198_vm1, %v3197_v9 }
 0xdec   :  { %2912 = vmatprep.subr.mxu1 %v3197_v9 }
 0xded   :  { %2913 = vmatpush3.msra.mxu1 %v3312_v12 }
 0xdee   :  { %2914 = vmatprep.subr.mxu1 %v3197_v9 }
 0xdef   :  { %2915 = vmatpush3.msra.mxu1 %v3327_v15 }
 0xdf0   :  { %2916 = vmatprep.subr.mxu1 %v3197_v9 }
 0xdf1   :  { %v1241_v5 = vld [vmem:[#allocation3 + $0x20] sm:$0xff]  ;;  %2917 = vmatpush3.msra.mxu1 %v3352_v20 }
 0xdf2   :  { %v1242_v7 = vsel %vm59_vm7, %v1240_v4, %v1241_v5  ;;  %v1244_v8 = vsel %vm59_vm7, %v1241_v5, %v1240_v4  ;;  %2941 = vmatprep.subr.mxu1 %v3197_v9 }
 0xdf3   :  { %1243 = vst.msk [vmem:[#allocation3 + $0x18] sm:$0xff] %vm389_vm6, %v1242_v7  ;;  %1245 = vst.msk [vmem:[#allocation3 + $0x20] sm:$0xff] %vm389_vm6, %v1244_v8  ;;  %v1257_v8 = vld [vmem:[%s3977_s5 + $0x18] sm:$0xff] }
 0xdf4   :  { %2921 = vmatprep.subr.mxu0 %v1257_v8 }
 0xeaa   :  { %v979_v12 = vpop.f32.mrf.mxu1 }
 0xeab   :  { %v983_v15 = vadd.f32 %v979_v12, %v376_v55  ;;  %v1256_v12 = vld [vmem:[%s3977_s5 + $0x10] sm:$0xff] }
 0xeac   :  { %v2898_v20 = vpop.f32.mrf.mxu1 }
 0xead   :  { %v2626_v10 = vmul.f32 -1.442695, %v983_v15 }
 0xeaf   :  { %3109 = vpow2.f32 %v2626_v10  ;;  %v1255_v10 = vld [vmem:[%s3977_s5 + $0x8] sm:$0xff] }
 0xeb0   :  { %3111 = vtanh.f32 %v983_v15 }
 0xebc   :  { %v3110_v11 = vpop.eup %3109 }
 0xebd   :  { %v987_v54 = vadd.f32 1.0, %v3110_v11  ;;  %v3112_v14 = vpop.eup %3111  ;;  %v1254_v11 = vld [vmem:[%s3977_s5] sm:$0xff] }
 0xebf   :  { %3113 = vrcp.f32 %v987_v54  ;;  %v3631_v54 = vld [vmem:[%s3978_s6 + $0x18] sm:$0xff] }
 0xecc   :  { %v3114_v16 = vpop.eup %3113 }
 0xecd   :  { %v991_v17 = vsel %vm3449_vm5, %v3112_v14, %v3114_v16  ;;  %v3638_v14 = vld [vmem:[%s3978_s6 + $0x10] sm:$0xff]  ;;  %v3645_v16 = vld [vmem:[%s3978_s6 + $0x8] sm:$0xff] }
 0xece   :  { %994 = vrot.lane.b32.xlu0 %v991_v17, %s3199_s3  ;;  %v992_v42 = vmul.f32 %v991_v17, %v898_v62 }
 0xf40   :  { %v995_v18 = vpop.permute.xlu0 %994 }
 0xf41   :  { %v997_v19 = vmul.f32 %v995_v18, %v991_v17 }
 0xf43   :  { %999 = vrot.lane.b32.xlu1 %v997_v19, %s3200_s4  ;;  %v1222_v19 = vld [vmem:[#allocation3] sm:$0xff] }
 0xfb5   :  { %v1000_v48 = vpop.permute.xlu1 %999 }
 0xfb6   :  { %v1002_v55 = vadd.f32 %v1000_v48, %v992_v42 }
 0xfb8   :  { %3115 = vtanh.f32 %v1002_v55 }
 0xfc5   :  { %v3116_v21 = vpop.eup %3115 }
 0xfc6   :  { %1005 = vrot.lane.b32.xlu0 %v3116_v21, %s3199_s3 }
0x1038   :  { %v1006_v22 = vpop.permute.xlu0 %1005 }
0x1039   :  { %v1008_v23 = vmul.f32 %v1006_v22, %v991_v17  ;;  %v3652_v17 = vld [vmem:[%s3978_s6] sm:$0xff] }
0x103b   :  { %1010 = vrot.lane.b32.xlu1 %v1008_v23, %s3200_s4 }
0x10ad   :  { %v1011_v24 = vpop.permute.xlu1 %1010 }
0x10ae   :  { %1013 = vst.msk [vmem:[#allocation3 + $0x28] sm:$0xff] %vm389_vm6, %v1011_v24  ;;  %2908 = vmatmul.mubr.msk.f32.vlgmr.msra.gmra.mxu0 %vm389_vm6, %v1011_v24  ;;  %v1249_v24 = vld [vmem:[#allocation3 + $0x18] sm:$0xff] }
0x10af   :  { %2922 = vmatpush3.msra.mxu0 %v1257_v8 }
0x10b0   :  { %2923 = vmatprep.subr.mxu0 %v1256_v12 }
0x10b1   :  { %2924 = vmatpush3.msra.mxu0 %v1256_v12 }
0x10b2   :  { %2925 = vmatprep.subr.mxu0 %v1255_v10 }
0x10b3   :  { %2926 = vmatpush3.msra.mxu0 %v1255_v10 }
0x10b4   :  { %2927 = vmatprep.subr.mxu0 %v1254_v11 }
0x10b5   :  { %v1235_v26 = vld [vmem:[#allocation3 + $0x28] sm:$0xff]  ;;  %2928 = vmatpush3.msra.mxu0 %v1254_v11 }
0x10b6   :  { %v1236_v27 = vsel %vm59_vm7, %v1234_v25, %v1235_v26  ;;  %v1238_v28 = vsel %vm59_vm7, %v1235_v26, %v1234_v25  ;;  %2963 = vmatprep.subr.mxu0 %v3197_v9  ;;  %v1250_v25 = vld [vmem:[#allocation3 + $0x20] sm:$0xff] }
0x10b7   :  { %1237 = vst.msk [vmem:[#allocation3 + $0x10] sm:$0xff] %vm389_vm6, %v1236_v27  ;;  %1239 = vst.msk [vmem:[#allocation3 + $0x28] sm:$0xff] %vm389_vm6, %v1238_v28 }
0x10be   :  { %v1248_v23 = vld [vmem:[#allocation3 + $0x10] sm:$0xff]  ;;  %v1251_v26 = vld [vmem:[#allocation3 + $0x28] sm:$0xff] }
0x116e   :  { %v1083_v29 = vpop.f32.mrf.mxu0 }
0x116f   :  { %v1087_v32 = vadd.f32 %v1083_v29, %v370_v6 }
0x1170   :  { %v2909_v33 = vpop.f32.mrf.mxu0 }
0x1171   :  { %v2628_v34 = vmul.f32 -1.442695, %v1087_v32  ;;  %v2631_v33 = vld [vmem:[%s3979_s7] ss:$0 sm:$0xff] }
0x1173   :  { %3117 = vpow2.f32 %v2628_v34 }
0x1174   :  { %3119 = vtanh.f32 %v1087_v32 }
0x1180   :  { %v3118_v61 = vpop.eup %3117 }
0x1181   :  { %v1091_v35 = vadd.f32 1.0, %v3118_v61  ;;  %v3120_v36 = vpop.eup %3119 }
0x1183   :  { %3121 = vrcp.f32 %v1091_v35 }
0x1190   :  { %v3122_v37 = vpop.eup %3121 }
0x1191   :  { %v1095_v39 = vsel %vm3449_vm5, %v3120_v36, %v3122_v37 }
0x1192   :  { %1098 = vrot.lane.b32.xlu0 %v1095_v39, %s3199_s3  ;;  %v1096_v31 = vmul.f32 %v1095_v39, %v1002_v55 }
0x1204   :  { %v1099_v40 = vpop.permute.xlu0 %1098 }
0x1205   :  { %v1101_v41 = vmul.f32 %v1099_v40, %v1095_v39 }
0x1207   :  { %1103 = vrot.lane.b32.xlu1 %v1101_v41, %s3200_s4 }
0x1279   :  { %v1104_v0 = vpop.permute.xlu1 %1103 }
0x127a   :  { %v1106_v6 = vadd.f32 %v1104_v0, %v1096_v31 }
0x127c   :  { %3123 = vtanh.f32 %v1106_v6 }
0x1289   :  { %v3124_v43 = vpop.eup %3123 }
0x128a   :  { %1109 = vrot.lane.b32.xlu0 %v3124_v43, %s3199_s3 }
0x12fc   :  { %v1110_v44 = vpop.permute.xlu0 %1109 }
0x12fd   :  { %v1112_v45 = vmul.f32 %v1110_v44, %v1095_v39 }
0x12ff   :  { %1114 = vrot.lane.b32.xlu1 %v1112_v45, %s3200_s4 }
0x1371   :  { %v1115_v46 = vpop.permute.xlu1 %1114 }
0x1372   :  { %1117 = vst.msk [vmem:[#allocation3 + $0x30] sm:$0xff] %vm389_vm6, %v1115_v46  ;;  %2919 = vmatmul.mubr.msk.f32.vlgmr.msra.gmra.mxu1 %vm389_vm6, %v1115_v46 }
0x1373   :  { %2949 = vmatprep.mubr.msk.f32.mxu1 %vm3198_vm1, %v3197_v9  ;;  %2942 = vmatpush3.msra.mxu1 %v3631_v54 }
0x1374   :  { %2943 = vmatprep.subr.mxu1 %v3197_v9 }
0x1375   :  { %2944 = vmatpush3.msra.mxu1 %v3638_v14 }
0x1376   :  { %2945 = vmatprep.subr.mxu1 %v3197_v9 }
0x1377   :  { %2946 = vmatpush3.msra.mxu1 %v3645_v16 }
0x1378   :  { %2947 = vmatprep.subr.mxu1 %v3197_v9 }
0x1379   :  { %v1229_v50 = vld [vmem:[#allocation3 + $0x30] sm:$0xff]  ;;  %2948 = vmatpush3.msra.mxu1 %v3652_v17 }
0x137a   :  { %v1230_v51 = vsel %vm59_vm7, %v1228_v49, %v1229_v50  ;;  %v1232_v53 = vsel %vm59_vm7, %v1229_v50, %v1228_v49  ;;  %2950 = vmatmul.mubr.f32.vlgmr.msra.gmra.mxu1 %v3197_v9  ;;  %2952 = vmatprep.subr.mxu1 %v3197_v9 }
0x137b   :  { %1231 = vst.msk [vmem:[#allocation3 + $0x8] sm:$0xff] %vm389_vm6, %v1230_v51  ;;  %1233 = vst.msk [vmem:[#allocation3 + $0x30] sm:$0xff] %vm389_vm6, %v1232_v53  ;;  %2953 = vmatpush3.msra.mxu1 %v3631_v54  ;;  %2960 = vmatprep.mubr.msk.f32.mxu1 %vm3198_vm1, %v3197_v9 }
0x137c   :  { %2954 = vmatprep.subr.mxu1 %v3197_v9 }
0x137d   :  { %2955 = vmatpush3.msra.mxu1 %v3638_v14 }
0x137e   :  { %2956 = vmatprep.subr.mxu1 %v3197_v9 }
0x137f   :  { %2957 = vmatpush3.msra.mxu1 %v3645_v16 }
0x1380   :  { %2958 = vmatprep.subr.mxu1 %v3197_v9 }
0x1381   :  { %2959 = vmatpush3.msra.mxu1 %v3652_v17 }
0x1382   :  { %2974 = vmatprep.subr.mxu1 %v3197_v9  ;;  %v1247_v22 = vld [vmem:[#allocation3 + $0x8] sm:$0xff]  ;;  %v1252_v27 = vld [vmem:[#allocation3 + $0x30] sm:$0xff] }
0x1432   :  { %v1187_v57 = vpop.f32.mrf.mxu1 }
0x1433   :  { %v1191_v58 = vadd.f32 %v1187_v57, %v364_v2 }
0x1434   :  { %v2920_v38 = vpop.f32.mrf.mxu1 }
0x1435   :  { %v2630_v52 = vmul.f32 -1.442695, %v1191_v58 }
0x1437   :  { %3125 = vpow2.f32 %v2630_v52 }
0x1438   :  { %3127 = vtanh.f32 %v1191_v58 }
0x143a   :  { %v1497_v29 = vpop.f32.mrf.mxu1 }
0x143c   :  { %v2951_v32 = vpop.f32.mrf.mxu1 }
0x1444   :  { %v3126_v62 = vpop.eup %3125 }
0x1445   :  { %v1195_v60 = vadd.f32 1.0, %v3126_v62  ;;  %v3128_v63 = vpop.eup %3127 }
0x1447   :  { %3129 = vrcp.f32 %v1195_v60 }
0x1454   :  { %v3130_v1 = vpop.eup %3129 }
0x1455   :  { %v1199_v3 = vsel %vm3449_vm5, %v3128_v63, %v3130_v1 }
0x1456   :  { %1202 = vrot.lane.b32.xlu0 %v1199_v3, %s3199_s3  ;;  %v1200_v56 = vmul.f32 %v1199_v3, %v1106_v6 }
0x14c8   :  { %v1203_v4 = vpop.permute.xlu0 %1202 }
0x14c9   :  { %v1205_v5 = vmul.f32 %v1203_v4, %v1199_v3 }
0x14cb   :  { %1207 = vrot.lane.b32.xlu1 %v1205_v5, %s3200_s4 }
0x153d   :  { %v1208_v59 = vpop.permute.xlu1 %1207 }
0x153e   :  { %v1210_v2 = vadd.f32 %v1208_v59, %v1200_v56 }
0x1540   :  { %3131 = vtanh.f32 %v1210_v2 }
0x154d   :  { %v3132_v7 = vpop.eup %3131 }
0x154e   :  { %1213 = vrot.lane.b32.xlu0 %v3132_v7, %s3199_s3 }
0x15c0   :  { %v1214_v15 = vpop.permute.xlu0 %1213 }
0x15c1   :  { %v1216_v20 = vmul.f32 %v1214_v15, %v1199_v3 }
0x15c3   :  { %1218 = vrot.lane.b32.xlu1 %v1216_v20, %s3200_s4 }
0x1635   :  { %v1219_v18 = vpop.permute.xlu1 %1218 }
0x1636   :  { %1221 = vst.msk [vmem:[#allocation3 + $0x38] sm:$0xff] %vm389_vm6, %v1219_v18 }
0x163d   :  { %v1223_v42 = vld [vmem:[#allocation3 + $0x38] sm:$0xff] }
0x163e   :  { %v1224_v48 = vsel %vm59_vm7, %v1222_v19, %v1223_v42  ;;  %v1226_v55 = vsel %vm59_vm7, %v1223_v42, %v1222_v19 }
0x163f   :  { %1225 = vst.msk [vmem:[#allocation3] sm:$0xff] %vm389_vm6, %v1224_v48  ;;  %1227 = vst.msk [vmem:[#allocation3 + $0x38] sm:$0xff] %vm389_vm6, %v1226_v55 }
0x1646   :  { %v1246_v21 = vld [vmem:[#allocation3] sm:$0xff]  ;;  %v1253_v28 = vld [vmem:[#allocation3 + $0x38] sm:$0xff] }
0x1647   :  { %2929 = vmatprep.mubr.msk.f32.mxu0 %vm389_vm6, %v1246_v21 }
0x1648   :  { %2930 = vmatmul.mubr.msk.f32.vlgmr.msra.gmra.mxu0 %vm389_vm6, %v1247_v22 }
0x1649   :  { %2932 = vmatprep.mubr.msk.f32.mxu0 %vm389_vm6, %v1248_v23  ;;  %2964 = vmatpush3.msra.mxu0 %v3631_v54 }
0x164a   :  { %2965 = vmatprep.subr.mxu0 %v3197_v9 }
0x164b   :  { %2966 = vmatpush3.msra.mxu0 %v3638_v14 }
0x164c   :  { %2933 = vmatmul.mubr.msk.f32.gmra.mxu0 %vm389_vm6, %v1249_v24  ;;  %2967 = vmatprep.subr.mxu0 %v3197_v9 }
0x164d   :  { %2935 = vmatprep.mubr.msk.f32.mxu0 %vm389_vm6, %v1250_v25  ;;  %2968 = vmatpush3.msra.mxu0 %v3645_v16 }
0x164e   :  { %2969 = vmatprep.subr.mxu0 %v3197_v9 }
0x164f   :  { %2970 = vmatpush3.msra.mxu0 %v3652_v17 }
0x1650   :  { %2936 = vmatmul.mubr.msk.f32.gmra.mxu0 %vm389_vm6, %v1251_v26  ;;  %2985 = vmatprep.subr.mxu0 %v3197_v9 }
0x1651   :  { %2938 = vmatprep.mubr.msk.f32.mxu0 %vm389_vm6, %v1252_v27 }
0x1654   :  { %2939 = vmatmul.mubr.msk.f32.gmra.mxu0 %vm389_vm6, %v1253_v28 }
0x1655   :  { %2971 = vmatprep.mubr.msk.f32.mxu0 %vm3198_vm1, %v3197_v9 }
0x1708   :  { %v2931_v34 = vpop.f32.mrf.mxu0 }
0x1709   :  { %v3695_v61 = vadd.f32 %v2931_v34, %v2631_v33 }
0x170a   :  { %v1355_v35 = vpop.f32.mrf.mxu0 }
0x170b   :  { %v3713_v46 = vadd.f32 %v2631_v33, %v1355_v35 }
0x170c   :  { %v2934_v36 = vpop.f32.mrf.mxu0 }
0x170d   :  { %v3697_v37 = vadd.f32 %v2934_v36, %v2631_v33 }
0x170e   :  { %v1365_v39 = vpop.f32.mrf.mxu0 }
0x170f   :  { %v3699_v40 = vadd.f32 %v2631_v33, %v1365_v39 }
0x1710   :  { %v2937_v41 = vpop.f32.mrf.mxu0 }
0x1711   :  { %v3701_v31 = vadd.f32 %v2937_v41, %v2631_v33 }
0x1712   :  { %v1375_v0 = vpop.f32.mrf.mxu0 }
0x1713   :  { %v3703_v6 = vadd.f32 %v2631_v33, %v1375_v0  ;;  %v1416_v43 = vsel %vm3401_vm2, %v3699_v40, %v3701_v31  ;;  %v1418_v44 = vsel %vm3401_vm2, %v3701_v31, %v3699_v40 }
0x1714   :  { %v2940_v45 = vpop.f32.mrf.mxu0 }
0x1715   :  { %v3715_v49 = vadd.f32 %v2940_v45, %v2631_v33  ;;  %v1422_v50 = vsel %vm3401_vm2, %v3697_v37, %v3703_v6  ;;  %v1424_v51 = vsel %vm3401_vm2, %v3703_v6, %v3697_v37 }
0x1716   :  { %v1385_v53 = vpop.f32.mrf.mxu0 }
0x1717   :  { %v1404_v57 = vsel %vm3401_vm2, %v3713_v46, %v3715_v49  ;;  %v3729_v58 = vadd.f32 %v2631_v33, %v1385_v53  ;;  %v1406_v38 = vsel %vm3401_vm2, %v3715_v49, %v3713_v46 }
0x1718   :  { %v1501_v52 = vadd.f32 %v1497_v29, %v1404_v57 }
0x1719   :  { %v1410_v62 = vsel %vm3401_vm2, %v3695_v61, %v3729_v58  ;;  %v1412_v60 = vsel %vm3401_vm2, %v3729_v58, %v3695_v61 }
0x171a   :  { %v2640_v63 = vmul.f32 -1.442695, %v1501_v52 }
0x171c   :  { %3133 = vpow2.f32 %v2640_v63 }
0x171d   :  { %3135 = vtanh.f32 %v1501_v52 }
0x1729   :  { %v3134_v1 = vpop.eup %3133 }
0x172a   :  { %v1505_v3 = vadd.f32 1.0, %v3134_v1  ;;  %v3136_v4 = vpop.eup %3135 }
0x172c   :  { %3137 = vrcp.f32 %v1505_v3 }
0x1739   :  { %v3138_v5 = vpop.eup %3137 }
0x173a   :  { %v1509_v56 = vsel %vm3449_vm5, %v3136_v4, %v3138_v5 }
0x173b   :  { %1512 = vrot.lane.b32.xlu0 %v1509_v56, %s3199_s3  ;;  %v1510_v7 = vmul.f32 0.0, %v1509_v56 }
0x17ad   :  { %v1513_v59 = vpop.permute.xlu0 %1512 }
0x17ae   :  { %v1515_v2 = vmul.f32 %v1513_v59, %v1509_v56 }
0x17b0   :  { %1517 = vrot.lane.b32.xlu1 %v1515_v2, %s3200_s4 }
0x1822   :  { %v1518_v8 = vpop.permute.xlu1 %1517 }
0x1823   :  { %v1520_v12 = vadd.f32 %v1518_v8, %v1510_v7 }
0x1825   :  { %3139 = vtanh.f32 %v1520_v12 }
0x1832   :  { %v3140_v15 = vpop.eup %3139 }
0x1833   :  { %1523 = vrot.lane.b32.xlu0 %v3140_v15, %s3199_s3 }
0x18a5   :  { %v1524_v20 = vpop.permute.xlu0 %1523 }
0x18a6   :  { %v1526_v10 = vmul.f32 %v1524_v20, %v1509_v56 }
0x18a8   :  { %1528 = vrot.lane.b32.xlu1 %v1526_v10, %s3200_s4 }
0x191a   :  { %v1529_v11 = vpop.permute.xlu1 %1528 }
0x191b   :  { %1531 = vst.msk [vmem:[#allocation3] sm:$0xff] %vm389_vm6, %v1529_v11  ;;  %2961 = vmatmul.mubr.msk.f32.vlgmr.msra.gmra.mxu1 %vm389_vm6, %v1529_v11 }
0x191c   :  { %2975 = vmatpush3.msra.mxu1 %v3631_v54  ;;  %2982 = vmatprep.mubr.msk.f32.mxu1 %vm3198_vm1, %v3197_v9 }
0x191d   :  { %2976 = vmatprep.subr.mxu1 %v3197_v9 }
0x191e   :  { %2977 = vmatpush3.msra.mxu1 %v3638_v14 }
0x191f   :  { %2978 = vmatprep.subr.mxu1 %v3197_v9 }
0x1920   :  { %2979 = vmatpush3.msra.mxu1 %v3645_v16 }
0x1921   :  { %2980 = vmatprep.subr.mxu1 %v3197_v9 }
0x1922   :  { %2981 = vmatpush3.msra.mxu1 %v3652_v17 }
0x1923   :  { %2996 = vmatprep.subr.mxu1 %v3197_v9 }
0x19db   :  { %v1601_v18 = vpop.f32.mrf.mxu1 }
0x19dc   :  { %v1605_v19 = vadd.f32 %v1601_v18, %v1410_v62 }
0x19dd   :  { %v2962_v42 = vpop.f32.mrf.mxu1 }
0x19de   :  { %v2642_v48 = vmul.f32 -1.442695, %v1605_v19 }
0x19e0   :  { %3141 = vpow2.f32 %v2642_v48 }
0x19e1   :  { %3143 = vtanh.f32 %v1605_v19 }
0x19ed   :  { %v3142_v55 = vpop.eup %3141 }
0x19ee   :  { %v1609_v21 = vadd.f32 1.0, %v3142_v55  ;;  %v3144_v22 = vpop.eup %3143 }
0x19f0   :  { %3145 = vrcp.f32 %v1609_v21 }
0x19fd   :  { %v3146_v23 = vpop.eup %3145 }
0x19fe   :  { %v1613_v24 = vsel %vm3449_vm5, %v3144_v22, %v3146_v23 }
0x19ff   :  { %1616 = vrot.lane.b32.xlu0 %v1613_v24, %s3199_s3  ;;  %v1614_v27 = vmul.f32 %v1613_v24, %v1520_v12 }
0x1a71   :  { %v1617_v25 = vpop.permute.xlu0 %1616 }
0x1a72   :  { %v1619_v26 = vmul.f32 %v1617_v25, %v1613_v24 }
0x1a74   :  { %1621 = vrot.lane.b32.xlu1 %v1619_v26, %s3200_s4 }
0x1ae6   :  { %v1622_v28 = vpop.permute.xlu1 %1621 }
0x1ae7   :  { %v1624_v29 = vadd.f32 %v1622_v28, %v1614_v27 }
0x1ae9   :  { %3147 = vtanh.f32 %v1624_v29 }
0x1af6   :  { %v3148_v32 = vpop.eup %3147 }
0x1af7   :  { %1627 = vrot.lane.b32.xlu0 %v3148_v32, %s3199_s3 }
0x1b69   :  { %v1628_v33 = vpop.permute.xlu0 %1627 }
0x1b6a   :  { %v1630_v34 = vmul.f32 %v1628_v33, %v1613_v24 }
0x1b6c   :  { %1632 = vrot.lane.b32.xlu1 %v1630_v34, %s3200_s4 }
0x1bde   :  { %v1633_v35 = vpop.permute.xlu1 %1632 }
0x1bdf   :  { %1635 = vst.msk [vmem:[#allocation3 + $0x8] sm:$0xff] %vm389_vm6, %v1633_v35  ;;  %2972 = vmatmul.mubr.msk.f32.vlgmr.msra.gmra.mxu0 %vm389_vm6, %v1633_v35 }
0x1be0   :  { %2986 = vmatpush3.msra.mxu0 %v3631_v54  ;;  %2993 = vmatprep.mubr.msk.f32.mxu0 %vm3198_vm1, %v3197_v9 }
0x1be1   :  { %2987 = vmatprep.subr.mxu0 %v3197_v9 }
0x1be2   :  { %2988 = vmatpush3.msra.mxu0 %v3638_v14 }
0x1be3   :  { %2989 = vmatprep.subr.mxu0 %v3197_v9 }
0x1be4   :  { %2990 = vmatpush3.msra.mxu0 %v3645_v16 }
0x1be5   :  { %2991 = vmatprep.subr.mxu0 %v3197_v9 }
0x1be6   :  { %2992 = vmatpush3.msra.mxu0 %v3652_v17 }
0x1be7   :  { %3007 = vmatprep.subr.mxu0 %v3197_v9 }
0x1c9f   :  { %v1705_v36 = vpop.f32.mrf.mxu0 }
0x1ca0   :  { %v1709_v39 = vadd.f32 %v1705_v36, %v1416_v43 }
0x1ca1   :  { %v2973_v41 = vpop.f32.mrf.mxu0 }
0x1ca2   :  { %v2644_v0 = vmul.f32 -1.442695, %v1709_v39 }
0x1ca4   :  { %3149 = vpow2.f32 %v2644_v0 }
0x1ca5   :  { %3151 = vtanh.f32 %v1709_v39 }
0x1cb1   :  { %v3150_v45 = vpop.eup %3149 }
0x1cb2   :  { %v1713_v53 = vadd.f32 1.0, %v3150_v45  ;;  %v3152_v57 = vpop.eup %3151 }
0x1cb4   :  { %3153 = vrcp.f32 %v1713_v53 }
0x1cc1   :  { %v3154_v52 = vpop.eup %3153 }
0x1cc2   :  { %v1717_v62 = vsel %vm3449_vm5, %v3152_v57, %v3154_v52 }
0x1cc3   :  { %1720 = vrot.lane.b32.xlu0 %v1717_v62, %s3199_s3  ;;  %v1718_v3 = vmul.f32 %v1717_v62, %v1624_v29 }
0x1d35   :  { %v1721_v63 = vpop.permute.xlu0 %1720 }
0x1d36   :  { %v1723_v1 = vmul.f32 %v1721_v63, %v1717_v62 }
0x1d38   :  { %1725 = vrot.lane.b32.xlu1 %v1723_v1, %s3200_s4 }
0x1daa   :  { %v1726_v43 = vpop.permute.xlu1 %1725 }
0x1dab   :  { %v1728_v4 = vadd.f32 %v1726_v43, %v1718_v3 }
0x1dad   :  { %3155 = vtanh.f32 %v1728_v4 }
0x1dba   :  { %v3156_v5 = vpop.eup %3155 }
0x1dbb   :  { %1731 = vrot.lane.b32.xlu0 %v3156_v5, %s3199_s3 }
0x1e2d   :  { %v1732_v56 = vpop.permute.xlu0 %1731 }
0x1e2e   :  { %v1734_v59 = vmul.f32 %v1732_v56, %v1717_v62 }
0x1e30   :  { %1736 = vrot.lane.b32.xlu1 %v1734_v59, %s3200_s4 }
0x1ea2   :  { %v1737_v2 = vpop.permute.xlu1 %1736 }
0x1ea3   :  { %1739 = vst.msk [vmem:[#allocation3 + $0x10] sm:$0xff] %vm389_vm6, %v1737_v2  ;;  %2983 = vmatmul.mubr.msk.f32.vlgmr.msra.gmra.mxu1 %vm389_vm6, %v1737_v2 }
0x1ea4   :  { %2997 = vmatpush3.msra.mxu1 %v3631_v54  ;;  %3004 = vmatprep.mubr.msk.f32.mxu1 %vm3198_vm1, %v3197_v9 }
0x1ea5   :  { %2998 = vmatprep.subr.mxu1 %v3197_v9 }
0x1ea6   :  { %2999 = vmatpush3.msra.mxu1 %v3638_v14 }
0x1ea7   :  { %3000 = vmatprep.subr.mxu1 %v3197_v9 }
0x1ea8   :  { %3001 = vmatpush3.msra.mxu1 %v3645_v16 }
0x1ea9   :  { %3002 = vmatprep.subr.mxu1 %v3197_v9 }
0x1eaa   :  { %3003 = vmatpush3.msra.mxu1 %v3652_v17 }
0x1eab   :  { %3018 = vmatprep.subr.mxu1 %v3197_v9 }
0x1f63   :  { %v1809_v7 = vpop.f32.mrf.mxu1 }
0x1f64   :  { %v1813_v8 = vadd.f32 %v1809_v7, %v1422_v50 }
0x1f65   :  { %v2984_v12 = vpop.f32.mrf.mxu1 }
0x1f66   :  { %v2646_v15 = vmul.f32 -1.442695, %v1813_v8 }
0x1f68   :  { %3157 = vpow2.f32 %v2646_v15  ;;  %v2272_v15 = vld [vmem:[#allocation3 + $0x10] sm:$0xff] }
0x1f69   :  { %3159 = vtanh.f32 %v1813_v8 }
0x1f75   :  { %v3158_v20 = vpop.eup %3157 }
0x1f76   :  { %v1817_v10 = vadd.f32 1.0, %v3158_v20  ;;  %v3160_v11 = vpop.eup %3159 }
0x1f78   :  { %3161 = vrcp.f32 %v1817_v10 }
0x1f85   :  { %v3162_v18 = vpop.eup %3161 }
0x1f86   :  { %v1821_v19 = vsel %vm3449_vm5, %v3160_v11, %v3162_v18 }
0x1f87   :  { %1824 = vrot.lane.b32.xlu0 %v1821_v19, %s3199_s3  ;;  %v1822_v55 = vmul.f32 %v1821_v19, %v1728_v4 }
0x1ff9   :  { %v1825_v42 = vpop.permute.xlu0 %1824 }
0x1ffa   :  { %v1827_v48 = vmul.f32 %v1825_v42, %v1821_v19 }
0x1ffc   :  { %1829 = vrot.lane.b32.xlu1 %v1827_v48, %s3200_s4 }
0x206e   :  { %v1830_v50 = vpop.permute.xlu1 %1829 }
0x206f   :  { %v1832_v21 = vadd.f32 %v1830_v50, %v1822_v55 }
0x2071   :  { %3163 = vtanh.f32 %v1832_v21 }
0x207e   :  { %v3164_v22 = vpop.eup %3163 }
0x207f   :  { %1835 = vrot.lane.b32.xlu0 %v3164_v22, %s3199_s3 }
0x20f1   :  { %v1836_v23 = vpop.permute.xlu0 %1835 }
0x20f2   :  { %v1838_v24 = vmul.f32 %v1836_v23, %v1821_v19 }
0x20f4   :  { %1840 = vrot.lane.b32.xlu1 %v1838_v24, %s3200_s4 }
0x2166   :  { %v1841_v25 = vpop.permute.xlu1 %1840 }
0x2167   :  { %1843 = vst.msk [vmem:[#allocation3 + $0x18] sm:$0xff] %vm389_vm6, %v1841_v25  ;;  %2994 = vmatmul.mubr.msk.f32.vlgmr.msra.gmra.mxu0 %vm389_vm6, %v1841_v25 }
0x2168   :  { %3008 = vmatpush3.msra.mxu0 %v3631_v54  ;;  %3015 = vmatprep.mubr.msk.f32.mxu0 %vm3198_vm1, %v3197_v9 }
0x2169   :  { %3009 = vmatprep.subr.mxu0 %v3197_v9 }
0x216a   :  { %3010 = vmatpush3.msra.mxu0 %v3638_v14 }
0x216b   :  { %3011 = vmatprep.subr.mxu0 %v3197_v9 }
0x216c   :  { %3012 = vmatpush3.msra.mxu0 %v3645_v16 }
0x216d   :  { %3013 = vmatprep.subr.mxu0 %v3197_v9 }
0x216e   :  { %3014 = vmatpush3.msra.mxu0 %v3652_v17  ;;  %v2278_v52 = vld [vmem:[#allocation3 + $0x18] sm:$0xff] }
0x2227   :  { %v1913_v26 = vpop.f32.mrf.mxu0 }
0x2228   :  { %v1917_v27 = vadd.f32 %v1913_v26, %v1424_v51 }
0x2229   :  { %v2995_v28 = vpop.f32.mrf.mxu0 }
0x222a   :  { %v2648_v29 = vmul.f32 -1.442695, %v1917_v27 }
0x222c   :  { %3165 = vpow2.f32 %v2648_v29 }
0x222d   :  { %3167 = vtanh.f32 %v1917_v27 }
0x2239   :  { %v3166_v32 = vpop.eup %3165 }
0x223a   :  { %v1921_v33 = vadd.f32 1.0, %v3166_v32  ;;  %v3168_v34 = vpop.eup %3167  ;;  %v2266_v32 = vld [vmem:[#allocation3 + $0x8] sm:$0xff] }
0x223c   :  { %3169 = vrcp.f32 %v1921_v33 }
0x2249   :  { %v3170_v35 = vpop.eup %3169 }
0x224a   :  { %v1925_v36 = vsel %vm3449_vm5, %v3168_v34, %v3170_v35 }
0x224b   :  { %1928 = vrot.lane.b32.xlu0 %v1925_v36, %s3199_s3  ;;  %v1926_v37 = vmul.f32 %v1925_v36, %v1832_v21 }
0x22bd   :  { %v1929_v39 = vpop.permute.xlu0 %1928 }
0x22be   :  { %v1931_v41 = vmul.f32 %v1929_v39, %v1925_v36 }
0x22c0   :  { %1933 = vrot.lane.b32.xlu1 %v1931_v41, %s3200_s4 }
0x2332   :  { %v1934_v6 = vpop.permute.xlu1 %1933 }
0x2333   :  { %v1936_v51 = vadd.f32 %v1934_v6, %v1926_v37 }
0x2335   :  { %3171 = vtanh.f32 %v1936_v51 }
0x2342   :  { %v3172_v0 = vpop.eup %3171 }
0x2343   :  { %1939 = vrot.lane.b32.xlu0 %v3172_v0, %s3199_s3 }
0x23b5   :  { %v1940_v45 = vpop.permute.xlu0 %1939 }
0x23b6   :  { %v1942_v53 = vmul.f32 %v1940_v45, %v1925_v36 }
0x23b8   :  { %1944 = vrot.lane.b32.xlu1 %v1942_v53, %s3200_s4 }
0x242a   :  { %v1945_v57 = vpop.permute.xlu1 %1944 }
0x242b   :  { %1947 = vst.msk [vmem:[#allocation3 + $0x20] sm:$0xff] %vm389_vm6, %v1945_v57  ;;  %3005 = vmatmul.mubr.msk.f32.vlgmr.msra.gmra.mxu1 %vm389_vm6, %v1945_v57 }
0x242c   :  { %3019 = vmatpush3.msra.mxu1 %v3631_v54  ;;  %3026 = vmatprep.mubr.msk.f32.mxu1 %vm3198_vm1, %v3197_v9 }
0x242d   :  { %3020 = vmatprep.subr.mxu1 %v3197_v9 }
0x242e   :  { %3021 = vmatpush3.msra.mxu1 %v3638_v14 }
0x242f   :  { %3022 = vmatprep.subr.mxu1 %v3197_v9 }
0x2430   :  { %3023 = vmatpush3.msra.mxu1 %v3645_v16 }
0x2431   :  { %3024 = vmatprep.subr.mxu1 %v3197_v9 }
0x2432   :  { %v2279_v62 = vld [vmem:[#allocation3 + $0x20] sm:$0xff]  ;;  %3025 = vmatpush3.msra.mxu1 %v3652_v17 }
0x2433   :  { %v2280_v54 = vsel %vm59_vm7, %v2278_v52, %v2279_v62  ;;  %v2282_v63 = vsel %vm59_vm7, %v2279_v62, %v2278_v52 }
0x2434   :  { %2281 = vst.msk [vmem:[#allocation3 + $0x18] sm:$0xff] %vm389_vm6, %v2280_v54  ;;  %2283 = vst.msk [vmem:[#allocation3 + $0x20] sm:$0xff] %vm389_vm6, %v2282_v63  ;;  %v2303_v54 = vld [vmem:[%s3980_s8 + $0x18] sm:$0xff] }
0x2435   :  { %3029 = vmatprep.subr.mxu0 %v2303_v54 }
0x24eb   :  { %v2017_v14 = vpop.f32.mrf.mxu1 }
0x24ec   :  { %v2021_v9 = vadd.f32 %v2017_v14, %v1418_v44  ;;  %v2301_v14 = vld [vmem:[%s3980_s8 + $0x8] sm:$0xff] }
0x24ed   :  { %v3006_v16 = vpop.f32.mrf.mxu1 }
0x24ee   :  { %v2650_v1 = vmul.f32 -1.442695, %v2021_v9 }
0x24f0   :  { %3173 = vpow2.f32 %v2650_v1  ;;  %v2260_v1 = vld [vmem:[#allocation3] sm:$0xff] }
0x24f1   :  { %3175 = vtanh.f32 %v2021_v9  ;;  %v2300_v9 = vld [vmem:[%s3980_s8] sm:$0xff] }
0x24fd   :  { %v3174_v17 = vpop.eup %3173 }
0x24fe   :  { %v2025_v3 = vadd.f32 1.0, %v3174_v17  ;;  %v3176_v43 = vpop.eup %3175 }
0x2500   :  { %3177 = vrcp.f32 %v2025_v3 }
0x250d   :  { %v3178_v4 = vpop.eup %3177 }
0x250e   :  { %v2029_v5 = vsel %vm3449_vm5, %v3176_v43, %v3178_v4 }
0x250f   :  { %2032 = vrot.lane.b32.xlu0 %v2029_v5, %s3199_s3  ;;  %v2030_v40 = vmul.f32 %v2029_v5, %v1936_v51 }
0x2581   :  { %v2033_v56 = vpop.permute.xlu0 %2032 }
0x2582   :  { %v2035_v59 = vmul.f32 %v2033_v56, %v2029_v5 }
0x2584   :  { %2037 = vrot.lane.b32.xlu1 %v2035_v59, %s3200_s4 }
0x25f6   :  { %v2038_v31 = vpop.permute.xlu1 %2037 }
0x25f7   :  { %v2040_v44 = vadd.f32 %v2038_v31, %v2030_v40 }
0x25f9   :  { %3179 = vtanh.f32 %v2040_v44 }
0x2606   :  { %v3180_v2 = vpop.eup %3179 }
0x2607   :  { %2043 = vrot.lane.b32.xlu0 %v3180_v2, %s3199_s3  ;;  %v2288_v2 = vld [vmem:[#allocation3 + $0x20] sm:$0xff] }
0x2679   :  { %v2044_v7 = vpop.permute.xlu0 %2043 }
0x267a   :  { %v2046_v8 = vmul.f32 %v2044_v7, %v2029_v5  ;;  %v2296_v7 = vmax.f32 %v2288_v2, 0.0 }
0x267c   :  { %2048 = vrot.lane.b32.xlu1 %v2046_v8, %s3200_s4 }
0x26ee   :  { %v2049_v12 = vpop.permute.xlu1 %2048 }
0x26ef   :  { %2051 = vst.msk [vmem:[#allocation3 + $0x28] sm:$0xff] %vm389_vm6, %v2049_v12  ;;  %3016 = vmatmul.mubr.msk.f32.vlgmr.msra.gmra.mxu0 %vm389_vm6, %v2049_v12 }
0x26f0   :  { %3030 = vmatpush3.msra.mxu0 %v2303_v54 }
0x26f1   :  { %3031 = vmatprep.subr.mxu0 %v2302_v13 }
0x26f2   :  { %3032 = vmatpush3.msra.mxu0 %v2302_v13 }
0x26f3   :  { %3033 = vmatprep.subr.mxu0 %v2301_v14 }
0x26f4   :  { %3034 = vmatpush3.msra.mxu0 %v2301_v14 }
0x26f5   :  { %3035 = vmatprep.subr.mxu0 %v2300_v9 }
0x26f6   :  { %v2273_v20 = vld [vmem:[#allocation3 + $0x28] sm:$0xff]  ;;  %3036 = vmatpush3.msra.mxu0 %v2300_v9 }
0x26f7   :  { %v2274_v10 = vsel %vm59_vm7, %v2272_v15, %v2273_v20  ;;  %v2276_v11 = vsel %vm59_vm7, %v2273_v20, %v2272_v15 }
0x26f8   :  { %2275 = vst.msk [vmem:[#allocation3 + $0x10] sm:$0xff] %vm389_vm6, %v2274_v10  ;;  %2277 = vst.msk [vmem:[#allocation3 + $0x28] sm:$0xff] %vm389_vm6, %v2276_v11 }
0x26ff   :  { %v2286_v56 = vld [vmem:[#allocation3 + $0x10] sm:$0xff]  ;;  %v2289_v8 = vld [vmem:[#allocation3 + $0x28] sm:$0xff] }
0x2700   :  { %v2294_v31 = vmax.f32 %v2286_v56, 0.0  ;;  %v2297_v15 = vmax.f32 %v2289_v8, 0.0 }
0x27af   :  { %v2121_v18 = vpop.f32.mrf.mxu0 }
0x27b0   :  { %v2125_v19 = vadd.f32 %v2121_v18, %v1412_v60  ;;  %v2449_v18 = vld [vmem:[%s3981_s10 + $0x8] sm:$0xff] }
0x27b1   :  { %v3017_v42 = vpop.f32.mrf.mxu0  ;;  %3049 = vmatprep.subr.mxu1 %v2449_v18 }
0x27b2   :  { %v2652_v48 = vmul.f32 -1.442695, %v2125_v19  ;;  %v2655_v42 = vld [vmem:[%s3982_s9] ss:$0 sm:$0xff] }
0x27b4   :  { %3181 = vpow2.f32 %v2652_v48 }
0x27b5   :  { %3183 = vtanh.f32 %v2125_v19  ;;  %v2448_v19 = vld [vmem:[%s3981_s10] sm:$0xff] }
0x27c1   :  { %v3182_v55 = vpop.eup %3181 }
0x27c2   :  { %v2129_v50 = vadd.f32 1.0, %v3182_v55  ;;  %v3184_v21 = vpop.eup %3183 }
0x27c4   :  { %3185 = vrcp.f32 %v2129_v50 }
0x27d1   :  { %v3186_v22 = vpop.eup %3185 }
0x27d2   :  { %v2133_v23 = vsel %vm3449_vm5, %v3184_v21, %v3186_v22 }
0x27d3   :  { %2136 = vrot.lane.b32.xlu0 %v2133_v23, %s3199_s3  ;;  %v2134_v61 = vmul.f32 %v2133_v23, %v2040_v44  ;;  %v2287_v44 = vld [vmem:[#allocation3 + $0x18] sm:$0xff] }
0x27d4   :  { %v2295_v30 = vmax.f32 %v2287_v44, 0.0 }
0x2845   :  { %v2137_v24 = vpop.permute.xlu0 %2136 }
0x2846   :  { %v2139_v25 = vmul.f32 %v2137_v24, %v2133_v23 }
0x2848   :  { %2141 = vrot.lane.b32.xlu1 %v2139_v25, %s3200_s4 }
0x28ba   :  { %v2142_v58 = vpop.permute.xlu1 %2141 }
0x28bb   :  { %v2144_v60 = vadd.f32 %v2142_v58, %v2134_v61 }
0x28bd   :  { %3187 = vtanh.f32 %v2144_v60 }
0x28ca   :  { %v3188_v26 = vpop.eup %3187 }
0x28cb   :  { %2147 = vrot.lane.b32.xlu0 %v3188_v26, %s3199_s3 }
0x293d   :  { %v2148_v27 = vpop.permute.xlu0 %2147 }
0x293e   :  { %v2150_v28 = vmul.f32 %v2148_v27, %v2133_v23 }
0x2940   :  { %2152 = vrot.lane.b32.xlu1 %v2150_v28, %s3200_s4 }
0x29b2   :  { %v2153_v29 = vpop.permute.xlu1 %2152 }
0x29b3   :  { %2155 = vst.msk [vmem:[#allocation3 + $0x30] sm:$0xff] %vm389_vm6, %v2153_v29  ;;  %3027 = vmatmul.mubr.msk.f32.vlgmr.msra.gmra.mxu1 %vm389_vm6, %v2153_v29 }
0x29b4   :  { %3050 = vmatpush3.msra.mxu1 %v2449_v18 }
0x29b5   :  { %3051 = vmatprep.subr.mxu1 %v2448_v19 }
0x29b6   :  { %3052 = vmatpush3.msra.mxu1 %v2448_v19 }
0x29ba   :  { %v2267_v33 = vld [vmem:[#allocation3 + $0x30] sm:$0xff] }
0x29bb   :  { %v2268_v34 = vsel %vm59_vm7, %v2266_v32, %v2267_v33  ;;  %v2270_v35 = vsel %vm59_vm7, %v2267_v33, %v2266_v32 }
0x29bc   :  { %2269 = vst.msk [vmem:[#allocation3 + $0x8] sm:$0xff] %vm389_vm6, %v2268_v34  ;;  %2271 = vst.msk [vmem:[#allocation3 + $0x30] sm:$0xff] %vm389_vm6, %v2270_v35 }
0x29c3   :  { %v2285_v4 = vld [vmem:[#allocation3 + $0x8] sm:$0xff]  ;;  %v2290_v12 = vld [vmem:[#allocation3 + $0x30] sm:$0xff] }
0x29c4   :  { %v2293_v40 = vmax.f32 %v2285_v4, 0.0  ;;  %v2298_v20 = vmax.f32 %v2290_v12, 0.0 }
0x2a73   :  { %v2225_v36 = vpop.f32.mrf.mxu1 }
0x2a74   :  { %v2229_v39 = vadd.f32 %v2225_v36, %v1406_v38 }
0x2a75   :  { %v3028_v41 = vpop.f32.mrf.mxu1 }
0x2a76   :  { %v2654_v37 = vmul.f32 -1.442695, %v2229_v39 }
0x2a78   :  { %3189 = vpow2.f32 %v2654_v37 }
0x2a79   :  { %3191 = vtanh.f32 %v2229_v39 }
0x2a85   :  { %v3190_v6 = vpop.eup %3189 }
0x2a86   :  { %v2233_v51 = vadd.f32 1.0, %v3190_v6  ;;  %v3192_v0 = vpop.eup %3191 }
0x2a88   :  { %3193 = vrcp.f32 %v2233_v51  ;;  %v2664_v51 = vld [vmem:[%s3983_s11] ss:$0 sm:$0xff] }
0x2a95   :  { %v3194_v45 = vpop.eup %3193 }
0x2a96   :  { %v2237_v53 = vsel %vm3449_vm5, %v3192_v0, %v3194_v45 }
0x2a97   :  { %2240 = vrot.lane.b32.xlu0 %v2237_v53, %s3199_s3  ;;  %v2238_v46 = vmul.f32 %v2237_v53, %v2144_v60 }
0x2b09   :  { %v2241_v57 = vpop.permute.xlu0 %2240 }
0x2b0a   :  { %v2243_v47 = vmul.f32 %v2241_v57, %v2237_v53 }
0x2b0c   :  { %2245 = vrot.lane.b32.xlu1 %v2243_v47, %s3200_s4 }
0x2b7e   :  { %v2246_v49 = vpop.permute.xlu1 %2245 }
0x2b7f   :  { %v2248_v38 = vadd.f32 %v2246_v49, %v2238_v46 }
0x2b81   :  { %3195 = vtanh.f32 %v2248_v38 }
0x2b8e   :  { %v3196_v52 = vpop.eup %3195 }
0x2b8f   :  { %2251 = vrot.lane.b32.xlu0 %v3196_v52, %s3199_s3 }
0x2c01   :  { %v2252_v62 = vpop.permute.xlu0 %2251 }
0x2c02   :  { %v2254_v63 = vmul.f32 %v2252_v62, %v2237_v53 }
0x2c04   :  { %2256 = vrot.lane.b32.xlu1 %v2254_v63, %s3200_s4 }
0x2c76   :  { %v2257_v16 = vpop.permute.xlu1 %2256 }
0x2c77   :  { %2259 = vst.msk [vmem:[#allocation3 + $0x38] sm:$0xff] %vm389_vm6, %v2257_v16 }
0x2c7e   :  { %v2261_v17 = vld [vmem:[#allocation3 + $0x38] sm:$0xff] }
0x2c7f   :  { %v2262_v3 = vsel %vm59_vm7, %v2260_v1, %v2261_v17  ;;  %v2264_v43 = vsel %vm59_vm7, %v2261_v17, %v2260_v1 }
0x2c80   :  { %2263 = vst.msk [vmem:[#allocation3] sm:$0xff] %vm389_vm6, %v2262_v3  ;;  %2265 = vst.msk [vmem:[#allocation3 + $0x38] sm:$0xff] %vm389_vm6, %v2264_v43 }
0x2c87   :  { %v2284_v5 = vld [vmem:[#allocation3] sm:$0xff]  ;;  %v2291_v10 = vld [vmem:[#allocation3 + $0x38] sm:$0xff] }
0x2c88   :  { %v2292_v59 = vmax.f32 %v2284_v5, 0.0  ;;  %v2299_v11 = vmax.f32 %v2291_v10, 0.0 }
0x2c8a   :  { %3037 = vmatprep.mubr.msk.f32.mxu0 %vm389_vm6, %v2292_v59 }
0x2c8b   :  { %3038 = vmatmul.mubr.msk.f32.vlgmr.msra.gmra.mxu0 %vm389_vm6, %v2293_v40 }
0x2c8c   :  { %3040 = vmatprep.mubr.msk.f32.mxu0 %vm389_vm6, %v2294_v31 }
0x2c8f   :  { %3041 = vmatmul.mubr.msk.f32.gmra.mxu0 %vm389_vm6, %v2295_v30 }
0x2c90   :  { %3043 = vmatprep.mubr.msk.f32.mxu0 %vm389_vm6, %v2296_v7 }
0x2c93   :  { %3044 = vmatmul.mubr.msk.f32.gmra.mxu0 %vm389_vm6, %v2297_v15 }
0x2c94   :  { %3046 = vmatprep.mubr.msk.f32.mxu0 %vm389_vm6, %v2298_v20 }
0x2c97   :  { %3047 = vmatmul.mubr.msk.f32.gmra.mxu0 %vm389_vm6, %v2299_v11 }
0x2d4b   :  { %v3039_v48 = vpop.f32.mrf.mxu0 }
0x2d4c   :  { %v2407_v55 = vadd.f32 %v3039_v48, %v2655_v42 }
0x2d4d   :  { %v2401_v50 = vpop.f32.mrf.mxu0 }
0x2d4e   :  { %v2402_v21 = vadd.f32 %v2655_v42, %v2401_v50  ;;  %v2441_v24 = vmax.f32 %v2407_v55, 0.0 }
0x2d4f   :  { %v3042_v22 = vpop.f32.mrf.mxu0 }
0x2d50   :  { %v2440_v23 = vmax.f32 %v2402_v21, 0.0  ;;  %v2417_v25 = vadd.f32 %v3042_v22, %v2655_v42 }
0x2d51   :  { %v2411_v61 = vpop.f32.mrf.mxu0 }
0x2d52   :  { %v2412_v58 = vadd.f32 %v2655_v42, %v2411_v61  ;;  %3053 = vmatprep.mubr.msk.f32.mxu1 %vm2457_vm8, %v2440_v23  ;;  %v2443_v27 = vmax.f32 %v2417_v25, 0.0 }
0x2d53   :  { %v3045_v60 = vpop.f32.mrf.mxu0  ;;  %3054 = vmatmul.mubr.msk.f32.vlgmr.msra.gmra.mxu1 %vm2457_vm8, %v2441_v24 }
0x2d54   :  { %v2442_v26 = vmax.f32 %v2412_v58, 0.0  ;;  %v2427_v28 = vadd.f32 %v3045_v60, %v2655_v42 }
0x2d55   :  { %v2421_v29 = vpop.f32.mrf.mxu0 }
0x2d56   :  { %v2422_v32 = vadd.f32 %v2655_v42, %v2421_v29  ;;  %3056 = vmatprep.mubr.msk.f32.mxu1 %vm2457_vm8, %v2442_v26  ;;  %v2445_v35 = vmax.f32 %v2427_v28, 0.0 }
0x2d57   :  { %v3048_v33 = vpop.f32.mrf.mxu0  ;;  %3057 = vmatmul.mubr.msk.f32.gmra.mxu1 %vm2457_vm8, %v2443_v27 }
0x2d58   :  { %v2444_v34 = vmax.f32 %v2422_v32, 0.0  ;;  %v2437_v36 = vadd.f32 %v3048_v33, %v2655_v42 }
0x2d59   :  { %v2431_v39 = vpop.f32.mrf.mxu0 }
0x2d5a   :  { %v2432_v41 = vadd.f32 %v2655_v42, %v2431_v39  ;;  %3059 = vmatprep.mubr.msk.f32.mxu1 %vm2457_vm8, %v2444_v34  ;;  %v2447_v6 = vmax.f32 %v2437_v36, 0.0 }
0x2d5b   :  { %3060 = vmatmul.mubr.msk.f32.gmra.mxu1 %vm2457_vm8, %v2445_v35 }
0x2d5c   :  { %v2446_v37 = vmax.f32 %v2432_v41, 0.0 }
0x2d5e   :  { %3062 = vmatprep.mubr.msk.f32.mxu1 %vm2457_vm8, %v2446_v37 }
0x2d5f   :  { %3063 = vmatmul.mubr.msk.f32.gmra.mxu1 %vm2457_vm8, %v2447_v6 }
0x2e13   :  { %v3055_v0 = vpop.f32.mrf.mxu1 }
0x2e14   :  { %v2554_v45 = vadd.f32 %v3055_v0, %v2664_v51 }
0x2e15   :  { %v2548_v53 = vpop.f32.mrf.mxu1 }
0x2e16   :  { %2588 = vst [vmem:[%s3984_s12 + $0x8] sm:$0xff] %v2554_v45  ;;  %v2549_v57 = vadd.f32 %v2664_v51, %v2548_v53 }
0x2e17   :  { %v3058_v47 = vpop.f32.mrf.mxu1 }
0x2e18   :  { %2587 = vst [vmem:[%s3984_s12] sm:$0xff] %v2549_v57  ;;  %v2564_v46 = vadd.f32 %v3058_v47, %v2664_v51 }
0x2e19   :  { %v2558_v49 = vpop.f32.mrf.mxu1 }
0x2e1a   :  { %2590 = vst [vmem:[%s3984_s12 + $0x18] sm:$0xff] %v2564_v46  ;;  %v2559_v38 = vadd.f32 %v2664_v51, %v2558_v49 }
0x2e1b   :  { %v3061_v52 = vpop.f32.mrf.mxu1 }
0x2e1c   :  { %2589 = vst [vmem:[%s3984_s12 + $0x10] sm:$0xff] %v2559_v38  ;;  %v2574_v62 = vadd.f32 %v3061_v52, %v2664_v51 }
0x2e1d   :  { %v2568_v54 = vpop.f32.mrf.mxu1 }
0x2e1e   :  { %2592 = vst [vmem:[%s3984_s12 + $0x28] sm:$0xff] %v2574_v62  ;;  %v2569_v13 = vadd.f32 %v2664_v51, %v2568_v54 }
0x2e1f   :  { %v3064_v63 = vpop.f32.mrf.mxu1 }
0x2e20   :  { %2591 = vst [vmem:[%s3984_s12 + $0x20] sm:$0xff] %v2569_v13  ;;  %v2584_v14 = vadd.f32 %v3064_v63, %v2664_v51 }
0x2e21   :  { %v2578_v9 = vpop.f32.mrf.mxu1 }
0x2e22   :  { %2594 = vst [vmem:[%s3984_s12 + $0x38] sm:$0xff] %v2584_v14  ;;  %v2579_v16 = vadd.f32 %v2664_v51, %v2578_v9 }
0x2e24   :  { %2593 = vst [vmem:[%s3984_s12 + $0x30] sm:$0xff] %v2579_v16 }

</bundles_post_ra>
